<compile_context>
chip_gen: v6e
topology: v6e:2x2x1
jax: 0.10.0
libtpu: 0.0.40
codegen_flags: <defaults>
</compile_context>

<pallas_src>
import math

import jax
import jax.numpy as jnp
import numpy as np
from jax.experimental import pallas as pl
from jax.experimental.pallas import tpu as pltpu

D_MODEL = 32
NHEAD = 4
HEAD_DIM = D_MODEL // NHEAD
D_FF = 64
NUM_LAYERS = 2
LN_EPS = 1e-5  # torch.nn.LayerNorm default
LANES = 128


def _layernorm(x, g, b):
    mu = jnp.mean(x, axis=-1, keepdims=True)
    var = jnp.mean((x - mu) ** 2, axis=-1, keepdims=True)
    return (x - mu) * jax.lax.rsqrt(var + LN_EPS) * g + b


# --------------------------- fused multi-layer kernel ---------------------------
def _encoder_kernel(cls_ref, src_ref, consts_ref,
                    wqkv_ref, wkv_ref, wo_ref, w1_ref, w2_ref,
                    bqkv_ref, b1_ref, vec_ref, out_ref):
    f32 = jnp.float32
    TR, DP = cls_ref.shape                 # packed rows per step, packed width (=128)
    S = src_ref.shape[1]
    L = wqkv_ref.shape[0]

    HS = consts_ref[0]                     # (DP, DP) per-head sum (block diag of ones)
    GM = consts_ref[1]                     # (DP, DP) per-group mean (block diag / D)

    def ln(x, g, b):                       # packed LayerNorm over each 32-channel group
        mu = jnp.dot(x, GM, preferred_element_type=f32)
        xc = x - mu
        var = jnp.dot(xc * xc, GM, preferred_element_type=f32)
        return xc * jax.lax.rsqrt(var + LN_EPS) * g + b

    xs2 = src_ref[...].reshape(TR * S, DP)      # packed src tokens (fixed across layers)
    q = cls_ref[...]                            # (TR, DP) evolving packed CLS state

    for l in range(L):                          # small, fully unrolled layer loop
        Wqkv = wqkv_ref[l]                      # (DP, 3*DP)   [q|k|v], scale folded in q
        Wkv = wkv_ref[l]                        # (DP, 2*DP)   [k|v]
        Wo = wo_ref[l]                          # (DP, DP)
        W1 = w1_ref[l]                          # (DP, P*D_FF)
        W2 = w2_ref[l]                          # (P*D_FF, DP)
        bqkv = bqkv_ref[l]                      # (1, 3*DP)
        b1 = b1_ref[l]                          # (1, P*D_FF)
        V = vec_ref[l]                          # (8, DP) stacked bias / LN vectors
        bk, bv, bo = V[0:1], V[1:2], V[2:3]
        g1, be1 = V[3:4], V[4:5]
        b2, g2, be2 = V[5:6], V[6:7], V[7:8]

        # --- fused CLS q/k/v projection (one MXU matmul, lane-dense slices) ---
        qkv = jnp.dot(q, Wqkv, preferred_element_type=f32) + bqkv      # (TR, 3*DP)
        qs = qkv[:, 0:DP]                                              # scaled q
        kc = qkv[:, DP:2 * DP]                                         # CLS key
        vc = qkv[:, 2 * DP:3 * DP]                                     # CLS value

        # --- fused src k/v projection ---
        kvs = jnp.dot(xs2, Wkv, preferred_element_type=f32)            # (TR*S, 2*DP)
        ks = kvs[:, 0:DP] + bk
        vs = kvs[:, DP:2 * DP] + bv
        ks3 = ks.reshape(TR, S, DP)
        vs3 = vs.reshape(TR, S, DP)

        # --- per-head scores, replicated across each head's channels (stay 128-wide) ---
        sc_cls = jnp.dot(qs * kc, HS, preferred_element_type=f32)      # (TR, DP)
        prod = ks3 * qs[:, None, :]                                    # (TR, S, DP)
        sc_src = jnp.dot(prod.reshape(TR * S, DP), HS,
                         preferred_element_type=f32).reshape(TR, S, DP)

        # --- softmax over the S+1 keys (cls + src) ---
        m = jnp.maximum(sc_cls, jnp.max(sc_src, axis=1))               # (TR, DP)
        p_cls = jnp.exp(sc_cls - m)
        p_src = jnp.exp(sc_src - m[:, None, :])
        denom = p_cls + jnp.sum(p_src, axis=1)
        numer = p_cls * vc + jnp.sum(p_src * vs3, axis=1)
        attn = numer / denom                                           # (TR, DP)

        # --- output projection ---
        attn = jnp.dot(attn, Wo, preferred_element_type=f32) + bo

        # --- residual + LayerNorm 1 ---
        y = ln(q + attn, g1, be1)

        # --- ReLU feed-forward (dropout == identity in eval mode) ---
        h1 = jnp.maximum(jnp.dot(y, W1, preferred_element_type=f32) + b1, 0.0)
        h2 = jnp.dot(h1, W2, preferred_element_type=f32) + b2

        # --- residual + LayerNorm 2 ---
        q = ln(y + h2, g2, be2)

    out_ref[...] = q                            # lane-dense (TR, 128) writeback


# --------------------------------- wrapper ---------------------------------
def _pack_params(layer_params, P):
    """Build block-diagonal (lane-packed) per-layer weights, stacked along a layer axis."""
    eye = jnp.eye(P, dtype=jnp.float32)
    scale = 1.0 / math.sqrt(HEAD_DIM)

    def bd(w):                                   # (din, dout) -> (P*din, P*dout)
        return jnp.kron(eye, w)

    def rep(v):                                  # (1, n) -> (1, P*n)
        return jnp.tile(v, (1, P))

    wqkv, wkv, wo, w1, w2, bqkv, b1, vec = [], [], [], [], [], [], [], []
    for p in layer_params:
        wq_s = p["wq_t"] * scale                 # fold 1/sqrt(head_dim) into q weight
        bq_s = p["bq"] * scale                   # ... and into the q bias
        wqkv.append(jnp.concatenate([bd(wq_s), bd(p["wk_t"]), bd(p["wv_t"])], axis=1))
        wkv.append(jnp.concatenate([bd(p["wk_t"]), bd(p["wv_t"])], axis=1))
        wo.append(bd(p["wo_t"]))
        w1.append(bd(p["w1_t"]))
        w2.append(bd(p["w2_t"]))
        bqkv.append(jnp.concatenate([rep(bq_s), rep(p["bk"]), rep(p["bv"])], axis=1))
        b1.append(rep(p["b1"]))
        vec.append(jnp.concatenate(
            [rep(p["bk"]), rep(p["bv"]), rep(p["bo"]),
             rep(p["g1"]), rep(p["be1"]),
             rep(p["b2"]), rep(p["g2"]), rep(p["be2"])], axis=0))
    return (jnp.stack(wqkv), jnp.stack(wkv), jnp.stack(wo), jnp.stack(w1),
            jnp.stack(w2), jnp.stack(bqkv), jnp.stack(b1), jnp.stack(vec))


def _packed_consts(P, d_model, nhead):
    """[0] = per-head-sum block diagonal (E @ E^T), [1] = per-group mean matrix."""
    hd = d_model // nhead
    dp = P * d_model
    idx = np.arange(dp)
    hs = (idx[:, None] // hd == idx[None, :] // hd).astype(np.float32)
    gm = (idx[:, None] // d_model == idx[None, :] // d_model).astype(np.float32) / d_model
    return jnp.asarray(np.stack([hs, gm], axis=0))


def _choose_tile_rows(R, S, DP, max_tile_rows=512):
    """Pick the packed-row tile: VMEM-aware, and >= 2 grid steps when batch allows
    (so the 'parallel' grid axis can shard across v7x's 2 TensorCores)."""
    # keep each (TR*S, DP) f32 temporary around ~1 MiB; ~10 live temporaries plus the
    # double-buffered src block stay well under the 16-32 MiB scoped-VMEM defaults.
    budget = max(8, (1024 * 1024) // max(1, S * DP * 4))
    tr = min(max_tile_rows, budget)
    tr = max(8, (tr // 8) * 8)
    if R <= tr:
        if R >= 16:
            half = -(-R // 2)
            tr = ((half + 7) // 8) * 8          # 2 grid steps, sublane-aligned tile
        else:
            tr = R                              # tiny batch: one full-array block
    return tr


def cls_transformer_encoder(cls_tok, src, layer_params):
    """output = cls_token; for layer in layers: output = layer(output, src)."""
    B, _, D = cls_tok.shape
    S = src.shape[1]

    P = LANES // D if (D <= LANES and LANES % D == 0) else 1   # batch rows per lane row
    DP = P * D

    params = _pack_params(layer_params, P)
    consts = _packed_consts(P, D, NHEAD)

    R = -(-B // P)                              # packed rows needed
    TR = _choose_tile_rows(R, S, DP)
    Rp = -(-R // TR) * TR                       # padded packed rows
    Bp = Rp * P                                 # padded batch

    cls2 = cls_tok.reshape(B, D)
    if Bp != B:
        cls2 = jnp.pad(cls2, ((0, Bp - B), (0, 0)))
        src = jnp.pad(src, ((0, Bp - B), (0, 0), (0, 0)))

    # lane packing: 4 consecutive batch rows share one 128-lane row
    cls_packed = cls2.reshape(Rp, DP)
    src_packed = src.reshape(Rp, P, S, D).transpose(0, 2, 1, 3).reshape(Rp, S, DP)

    def const_spec(a):
        nd = a.ndim
        return pl.BlockSpec(a.shape, lambda r, _nd=nd: (0,) * _nd)

    out = pl.pallas_call(
        _encoder_kernel,
        out_shape=jax.ShapeDtypeStruct((Rp, DP), jnp.float32),
        grid_spec=pltpu.PrefetchScalarGridSpec(
            num_scalar_prefetch=0,
            grid=(Rp // TR,),
            in_specs=[
                pl.BlockSpec((TR, DP), lambda r: (r, 0)),
                pl.BlockSpec((TR, S, DP), lambda r: (r, 0, 0)),
                const_spec(consts),
                *[const_spec(a) for a in params],
            ],
            out_specs=pl.BlockSpec((TR, DP), lambda r: (r, 0)),
        ),
        compiler_params=pltpu.CompilerParams(
            dimension_semantics=("parallel",),
            vmem_limit_bytes=32 * 1024 * 1024),
    )(cls_packed, src_packed, consts, *params)

    return out.reshape(Bp, D)[:B].reshape(B, 1, D)


# ----------------------- pure-JAX reference (for checking) -----------------------
def ref_layer(cls_tok, src, p):
    x = jnp.concatenate([cls_tok, src], axis=1)
    B, S1, D = x.shape
    q = cls_tok @ p["wq_t"] + p["bq"]
    k = x @ p["wk_t"] + p["bk"]
    v = x @ p["wv_t"] + p["bv"]
    qh = q.reshape(B, 1, NHEAD, HEAD_DIM)
    kh = k.reshape(B, S1, NHEAD, HEAD_DIM)
    vh = v.reshape(B, S1, NHEAD, HEAD_DIM)
    sc = jnp.einsum("bqhc,bshc->bhqs", qh, kh) / math.sqrt(HEAD_DIM)
    pr = jax.nn.softmax(sc, axis=-1)
    at = jnp.einsum("bhqs,bshc->bqhc", pr, vh).reshape(B, 1, D)
    at = at @ p["wo_t"] + p["bo"]
    y = _layernorm(cls_tok + at, p["g1"], p["be1"])
    h = jax.nn.relu(y @ p["w1_t"] + p["b1"])
    return _layernorm(y + h @ p["w2_t"] + p["b2"], p["g2"], p["be2"])


# ----------------------- deterministic parameter init -----------------------
def init_layer_params(key):
    keys = jax.random.split(key, 12)

    def lin_w(k, out_dim, in_dim):
        return jax.random.normal(k, (out_dim, in_dim), jnp.float32) / math.sqrt(in_dim)

    wq = lin_w(keys[0], D_MODEL, D_MODEL)
    wk = lin_w(keys[1], D_MODEL, D_MODEL)
    wv = lin_w(keys[2], D_MODEL, D_MODEL)
    wo = lin_w(keys[3], D_MODEL, D_MODEL)
    w1 = lin_w(keys[4], D_FF, D_MODEL)
    w2 = lin_w(keys[5], D_MODEL, D_FF)
    nrm = lambda k, n: 0.02 * jax.random.normal(k, (1, n), jnp.float32)
    return {
        "wq_t": wq.T, "bq": nrm(keys[6], D_MODEL),
        "wk_t": wk.T, "bk": nrm(keys[7], D_MODEL),
        "wv_t": wv.T, "bv": nrm(keys[8], D_MODEL),
        "wo_t": wo.T, "bo": nrm(keys[9], D_MODEL),
        "g1": jnp.ones((1, D_MODEL), jnp.float32),
        "be1": jnp.zeros((1, D_MODEL), jnp.float32),
        "w1_t": w1.T, "b1": nrm(keys[10], D_FF),
        "w2_t": w2.T, "b2": nrm(keys[11], D_MODEL),
        "g2": jnp.ones((1, D_MODEL), jnp.float32),
        "be2": jnp.zeros((1, D_MODEL), jnp.float32),
    }


if __name__ == "__main__":
    key = jax.random.PRNGKey(0)
    k_cls, k_src, k_p, k_cls2, k_src2, k_cls3, k_src3 = jax.random.split(key, 7)
    layer_params = [init_layer_params(k) for k in jax.random.split(k_p, NUM_LAYERS)]

    def ref_forward(cls_tok, src):
        out = cls_tok
        for p in layer_params:
            out = ref_layer(out, src, p)
        return out

    # primary small check (B=2, S=8, D=32) -> one packed row
    B, S = 2, 8
    cls_tok = jax.random.normal(k_cls, (B, 1, D_MODEL), jnp.float32)
    src = jax.random.normal(k_src, (B, S, D_MODEL), jnp.float32)
    out = jax.block_until_ready(cls_transformer_encoder(cls_tok, src, layer_params))
    ref = jax.block_until_ready(ref_forward(cls_tok, src))
    assert out.shape == (B, 1, D_MODEL)
    np.testing.assert_allclose(np.asarray(out), np.asarray(ref), rtol=1e-4, atol=1e-4)

    # second check (B=16) -> 4 packed rows, still a single grid step
    B2, S2 = 16, 8
    cls_tok2 = jax.random.normal(k_cls2, (B2, 1, D_MODEL), jnp.float32)
    src2 = jax.random.normal(k_src2, (B2, S2, D_MODEL), jnp.float32)
    out2 = jax.block_until_ready(cls_transformer_encoder(cls_tok2, src2, layer_params))
    ref2 = jax.block_until_ready(ref_forward(cls_tok2, src2))
    np.testing.assert_allclose(np.asarray(out2), np.asarray(ref2), rtol=1e-4, atol=1e-4)

    # third check (B=70) -> exercises batch padding and a 2-step parallel grid
    B3, S3 = 70, 8
    cls_tok3 = jax.random.normal(k_cls3, (B3, 1, D_MODEL), jnp.float32)
    src3 = jax.random.normal(k_src3, (B3, S3, D_MODEL), jnp.float32)
    out3 = jax.block_until_ready(cls_transformer_encoder(cls_tok3, src3, layer_params))
    ref3 = jax.block_until_ready(ref_forward(cls_tok3, src3))
    np.testing.assert_allclose(np.asarray(out3), np.asarray(ref3), rtol=1e-4, atol=1e-4)

    print("KERNEL_OK")
</pallas_src>

<mosaic_0001>
module attributes {stable_mosaic.version = 11 : i64} {
  func.func @_encoder_kernel(%arg0: i32, %arg1: memref<1x128xf32, #tpu.memory_space<vmem>>, %arg2: memref<1x8x128xf32, #tpu.memory_space<vmem>>, %arg3: memref<2x128x128xf32, #tpu.memory_space<vmem>>, %arg4: memref<2x128x384xf32, #tpu.memory_space<vmem>>, %arg5: memref<2x128x256xf32, #tpu.memory_space<vmem>>, %arg6: memref<2x128x128xf32, #tpu.memory_space<vmem>>, %arg7: memref<2x128x256xf32, #tpu.memory_space<vmem>>, %arg8: memref<2x256x128xf32, #tpu.memory_space<vmem>>, %arg9: memref<2x1x384xf32, #tpu.memory_space<vmem>>, %arg10: memref<2x1x256xf32, #tpu.memory_space<vmem>>, %arg11: memref<2x8x128xf32, #tpu.memory_space<vmem>>, %arg12: memref<1x128xf32, #tpu.memory_space<vmem>>) attributes {dimension_semantics = [#tpu.dimension_semantics<parallel>], iteration_bounds = array<i64: 1>, scalar_prefetch = 0 : i64, scratch_operands = 0 : i64, tpu.core_type = #tpu.core_type<tc>, window_params = [{transform_indices = @transform_0, window_bounds = array<i64: 1, 128>}, {transform_indices = @transform_1, window_bounds = array<i64: 1, 8, 128>}, {pipeline_mode = #tpu.pipeline_mode<synchronous>, transform_indices = @transform_2, window_bounds = array<i64: 2, 128, 128>}, {pipeline_mode = #tpu.pipeline_mode<synchronous>, transform_indices = @transform_3, window_bounds = array<i64: 2, 128, 384>}, {pipeline_mode = #tpu.pipeline_mode<synchronous>, transform_indices = @transform_4, window_bounds = array<i64: 2, 128, 256>}, {pipeline_mode = #tpu.pipeline_mode<synchronous>, transform_indices = @transform_5, window_bounds = array<i64: 2, 128, 128>}, {pipeline_mode = #tpu.pipeline_mode<synchronous>, transform_indices = @transform_6, window_bounds = array<i64: 2, 128, 256>}, {pipeline_mode = #tpu.pipeline_mode<synchronous>, transform_indices = @transform_7, window_bounds = array<i64: 2, 256, 128>}, {pipeline_mode = #tpu.pipeline_mode<synchronous>, transform_indices = @transform_8, window_bounds = array<i64: 2, 1, 384>}, {pipeline_mode = #tpu.pipeline_mode<synchronous>, transform_indices = @transform_9, window_bounds = array<i64: 2, 1, 256>}, {pipeline_mode = #tpu.pipeline_mode<synchronous>, transform_indices = @transform_10, window_bounds = array<i64: 2, 8, 128>}, {transform_indices = @transform_11, window_bounds = array<i64: 1, 128>}]} {
    %c0 = arith.constant 0 : index
    %c0_0 = arith.constant 0 : index
    %c0_1 = arith.constant 0 : index
    %0 = vector.load %arg3[%c0, %c0_0, %c0_1] : memref<2x128x128xf32, #tpu.memory_space<vmem>>, vector<1x128x128xf32>
    %1 = vector.shape_cast %0 : vector<1x128x128xf32> to vector<128x128xf32>
    %c1 = arith.constant 1 : index
    %c0_2 = arith.constant 0 : index
    %c0_3 = arith.constant 0 : index
    %2 = vector.load %arg3[%c1, %c0_2, %c0_3] : memref<2x128x128xf32, #tpu.memory_space<vmem>>, vector<1x128x128xf32>
    %3 = vector.shape_cast %2 : vector<1x128x128xf32> to vector<128x128xf32>
    %c0_4 = arith.constant 0 : index
    %c0_5 = arith.constant 0 : index
    %c0_6 = arith.constant 0 : index
    %4 = vector.load %arg2[%c0_4, %c0_5, %c0_6] : memref<1x8x128xf32, #tpu.memory_space<vmem>>, vector<1x8x128xf32>
    %5 = vector.shape_cast %4 : vector<1x8x128xf32> to vector<8x128xf32>
    %c0_7 = arith.constant 0 : index
    %c0_8 = arith.constant 0 : index
    %6 = vector.load %arg1[%c0_7, %c0_8] : memref<1x128xf32, #tpu.memory_space<vmem>>, vector<1x128xf32>
    %c0_9 = arith.constant 0 : index
    %c0_10 = arith.constant 0 : index
    %c0_11 = arith.constant 0 : index
    %7 = vector.load %arg4[%c0_9, %c0_10, %c0_11] : memref<2x128x384xf32, #tpu.memory_space<vmem>>, vector<1x128x384xf32>
    %8 = vector.shape_cast %7 : vector<1x128x384xf32> to vector<128x384xf32>
    %c0_12 = arith.constant 0 : index
    %c0_13 = arith.constant 0 : index
    %c0_14 = arith.constant 0 : index
    %9 = vector.load %arg5[%c0_12, %c0_13, %c0_14] : memref<2x128x256xf32, #tpu.memory_space<vmem>>, vector<1x128x256xf32>
    %10 = vector.shape_cast %9 : vector<1x128x256xf32> to vector<128x256xf32>
    %c0_15 = arith.constant 0 : index
    %c0_16 = arith.constant 0 : index
    %c0_17 = arith.constant 0 : index
    %11 = vector.load %arg6[%c0_15, %c0_16, %c0_17] : memref<2x128x128xf32, #tpu.memory_space<vmem>>, vector<1x128x128xf32>
    %12 = vector.shape_cast %11 : vector<1x128x128xf32> to vector<128x128xf32>
    %c0_18 = arith.constant 0 : index
    %c0_19 = arith.constant 0 : index
    %c0_20 = arith.constant 0 : index
    %13 = vector.load %arg7[%c0_18, %c0_19, %c0_20] : memref<2x128x256xf32, #tpu.memory_space<vmem>>, vector<1x128x256xf32>
    %14 = vector.shape_cast %13 : vector<1x128x256xf32> to vector<128x256xf32>
    %c0_21 = arith.constant 0 : index
    %c0_22 = arith.constant 0 : index
    %c0_23 = arith.constant 0 : index
    %15 = vector.load %arg8[%c0_21, %c0_22, %c0_23] : memref<2x256x128xf32, #tpu.memory_space<vmem>>, vector<1x256x128xf32>
    %16 = vector.shape_cast %15 : vector<1x256x128xf32> to vector<256x128xf32>
    %c0_24 = arith.constant 0 : index
    %c0_25 = arith.constant 0 : index
    %c0_26 = arith.constant 0 : index
    %17 = vector.load %arg9[%c0_24, %c0_25, %c0_26] : memref<2x1x384xf32, #tpu.memory_space<vmem>>, vector<1x1x384xf32>
    %18 = vector.shape_cast %17 : vector<1x1x384xf32> to vector<1x384xf32>
    %c0_27 = arith.constant 0 : index
    %c0_28 = arith.constant 0 : index
    %c0_29 = arith.constant 0 : index
    %19 = vector.load %arg10[%c0_27, %c0_28, %c0_29] : memref<2x1x256xf32, #tpu.memory_space<vmem>>, vector<1x1x256xf32>
    %20 = vector.shape_cast %19 : vector<1x1x256xf32> to vector<1x256xf32>
    %c0_30 = arith.constant 0 : index
    %c0_31 = arith.constant 0 : index
    %c0_32 = arith.constant 0 : index
    %21 = vector.load %arg11[%c0_30, %c0_31, %c0_32] : memref<2x8x128xf32, #tpu.memory_space<vmem>>, vector<1x8x128xf32>
    %22 = vector.shape_cast %21 : vector<1x8x128xf32> to vector<8x128xf32>
    %23 = vector.extract_strided_slice %22 {offsets = [0, 0], sizes = [1, 128], strides = [1, 1]} : vector<8x128xf32> to vector<1x128xf32>
    %24 = vector.extract_strided_slice %22 {offsets = [1, 0], sizes = [1, 128], strides = [1, 1]} : vector<8x128xf32> to vector<1x128xf32>
    %25 = vector.extract_strided_slice %22 {offsets = [2, 0], sizes = [1, 128], strides = [1, 1]} : vector<8x128xf32> to vector<1x128xf32>
    %26 = vector.extract_strided_slice %22 {offsets = [3, 0], sizes = [1, 128], strides = [1, 1]} : vector<8x128xf32> to vector<1x128xf32>
    %27 = vector.extract_strided_slice %22 {offsets = [4, 0], sizes = [1, 128], strides = [1, 1]} : vector<8x128xf32> to vector<1x128xf32>
    %28 = vector.extract_strided_slice %22 {offsets = [5, 0], sizes = [1, 128], strides = [1, 1]} : vector<8x128xf32> to vector<1x128xf32>
    %29 = vector.extract_strided_slice %22 {offsets = [6, 0], sizes = [1, 128], strides = [1, 1]} : vector<8x128xf32> to vector<1x128xf32>
    %30 = vector.extract_strided_slice %22 {offsets = [7, 0], sizes = [1, 128], strides = [1, 1]} : vector<8x128xf32> to vector<1x128xf32>
    %cst = arith.constant dense<0.000000e+00> : vector<1x384xf32>
    %31 = tpu.matmul %6, %8, %cst {dimension_numbers = #tpu.dot_dimension_numbers<[1], [0], [0], [1], [0, 0, 1, 1], [], []>} : vector<1x128xf32>, vector<128x384xf32>, vector<1x384xf32> -> vector<1x384xf32>
    %32 = arith.addf %31, %18 : vector<1x384xf32>
    %33 = vector.extract_strided_slice %32 {offsets = [0, 0], sizes = [1, 128], strides = [1, 1]} : vector<1x384xf32> to vector<1x128xf32>
    %34 = vector.extract_strided_slice %32 {offsets = [0, 128], sizes = [1, 128], strides = [1, 1]} : vector<1x384xf32> to vector<1x128xf32>
    %35 = vector.extract_strided_slice %32 {offsets = [0, 256], sizes = [1, 128], strides = [1, 1]} : vector<1x384xf32> to vector<1x128xf32>
    %cst_33 = arith.constant dense<0.000000e+00> : vector<8x256xf32>
    %36 = tpu.matmul %5, %10, %cst_33 {dimension_numbers = #tpu.dot_dimension_numbers<[1], [0], [0], [1], [0, 0, 1, 1], [], []>} : vector<8x128xf32>, vector<128x256xf32>, vector<8x256xf32> -> vector<8x256xf32>
    %37 = vector.extract_strided_slice %36 {offsets = [0, 0], sizes = [8, 128], strides = [1, 1]} : vector<8x256xf32> to vector<8x128xf32>
    %38 = vector.broadcast %23 : vector<1x128xf32> to vector<8x128xf32>
    %39 = arith.addf %37, %38 : vector<8x128xf32>
    %40 = vector.extract_strided_slice %36 {offsets = [0, 128], sizes = [8, 128], strides = [1, 1]} : vector<8x256xf32> to vector<8x128xf32>
    %41 = vector.broadcast %24 : vector<1x128xf32> to vector<8x128xf32>
    %42 = arith.addf %40, %41 : vector<8x128xf32>
    %43 = vector.shape_cast %39 : vector<8x128xf32> to vector<1x8x128xf32>
    %44 = vector.shape_cast %42 : vector<8x128xf32> to vector<1x8x128xf32>
    %45 = arith.mulf %33, %34 : vector<1x128xf32>
    %cst_34 = arith.constant dense<0.000000e+00> : vector<1x128xf32>
    %46 = tpu.matmul %45, %1, %cst_34 {dimension_numbers = #tpu.dot_dimension_numbers<[1], [0], [0], [1], [0, 0, 1, 1], [], []>} : vector<1x128xf32>, vector<128x128xf32>, vector<1x128xf32> -> vector<1x128xf32>
    %47 = vector.shape_cast %33 : vector<1x128xf32> to vector<1x1x128xf32>
    %48 = vector.broadcast %47 : vector<1x1x128xf32> to vector<1x8x128xf32>
    %49 = arith.mulf %43, %48 : vector<1x8x128xf32>
    %50 = vector.shape_cast %49 : vector<1x8x128xf32> to vector<8x128xf32>
    %cst_35 = arith.constant dense<0.000000e+00> : vector<8x128xf32>
    %51 = tpu.matmul %50, %1, %cst_35 {dimension_numbers = #tpu.dot_dimension_numbers<[1], [0], [0], [1], [0, 0, 1, 1], [], []>} : vector<8x128xf32>, vector<128x128xf32>, vector<8x128xf32> -> vector<8x128xf32>
    %52 = vector.shape_cast %51 : vector<8x128xf32> to vector<1x8x128xf32>
    %cst_36 = arith.constant dense<0xFF800000> : vector<1x128xf32>
    %53 = vector.multi_reduction <maximumf>, %52, %cst_36 [1] : vector<1x8x128xf32> to vector<1x128xf32>
    %54 = arith.maximumf %46, %53 : vector<1x128xf32>
    %55 = arith.subf %46, %54 : vector<1x128xf32>
    %56 = math.exp %55 : vector<1x128xf32>
    %57 = vector.shape_cast %54 : vector<1x128xf32> to vector<1x1x128xf32>
    %58 = vector.broadcast %57 : vector<1x1x128xf32> to vector<1x8x128xf32>
    %59 = arith.subf %52, %58 : vector<1x8x128xf32>
    %60 = math.exp %59 : vector<1x8x128xf32>
    %cst_37 = arith.constant dense<0.000000e+00> : vector<1x128xf32>
    %61 = vector.multi_reduction <add>, %60, %cst_37 [1] : vector<1x8x128xf32> to vector<1x128xf32>
    %62 = arith.addf %56, %61 : vector<1x128xf32>
    %63 = arith.mulf %56, %35 : vector<1x128xf32>
    %64 = arith.mulf %60, %44 : vector<1x8x128xf32>
    %cst_38 = arith.constant dense<0.000000e+00> : vector<1x128xf32>
    %65 = vector.multi_reduction <add>, %64, %cst_38 [1] : vector<1x8x128xf32> to vector<1x128xf32>
    %66 = arith.addf %63, %65 : vector<1x128xf32>
    %67 = arith.divf %66, %62 : vector<1x128xf32>
    %cst_39 = arith.constant dense<0.000000e+00> : vector<1x128xf32>
    %68 = tpu.matmul %67, %12, %cst_39 {dimension_numbers = #tpu.dot_dimension_numbers<[1], [0], [0], [1], [0, 0, 1, 1], [], []>} : vector<1x128xf32>, vector<128x128xf32>, vector<1x128xf32> -> vector<1x128xf32>
    %69 = arith.addf %68, %25 : vector<1x128xf32>
    %70 = arith.addf %6, %69 : vector<1x128xf32>
    %cst_40 = arith.constant dense<0.000000e+00> : vector<1x128xf32>
    %71 = tpu.matmul %70, %3, %cst_40 {dimension_numbers = #tpu.dot_dimension_numbers<[1], [0], [0], [1], [0, 0, 1, 1], [], []>} : vector<1x128xf32>, vector<128x128xf32>, vector<1x128xf32> -> vector<1x128xf32>
    %72 = arith.subf %70, %71 : vector<1x128xf32>
    %73 = arith.mulf %72, %72 : vector<1x128xf32>
    %cst_41 = arith.constant dense<0.000000e+00> : vector<1x128xf32>
    %74 = tpu.matmul %73, %3, %cst_41 {dimension_numbers = #tpu.dot_dimension_numbers<[1], [0], [0], [1], [0, 0, 1, 1], [], []>} : vector<1x128xf32>, vector<128x128xf32>, vector<1x128xf32> -> vector<1x128xf32>
    %cst_42 = arith.constant 9.99999974E-6 : f32
    %75 = vector.broadcast %cst_42 : f32 to vector<1x128xf32>
    %76 = arith.addf %74, %75 : vector<1x128xf32>
    %77 = math.rsqrt %76 : vector<1x128xf32>
    %78 = arith.mulf %72, %77 : vector<1x128xf32>
    %79 = arith.mulf %78, %26 : vector<1x128xf32>
    %80 = arith.addf %79, %27 : vector<1x128xf32>
    %cst_43 = arith.constant dense<0.000000e+00> : vector<1x256xf32>
    %81 = tpu.matmul %80, %14, %cst_43 {dimension_numbers = #tpu.dot_dimension_numbers<[1], [0], [0], [1], [0, 0, 1, 1], [], []>} : vector<1x128xf32>, vector<128x256xf32>, vector<1x256xf32> -> vector<1x256xf32>
    %82 = arith.addf %81, %20 : vector<1x256xf32>
    %cst_44 = arith.constant 0.000000e+00 : f32
    %83 = vector.broadcast %cst_44 : f32 to vector<1x256xf32>
    %84 = arith.maximumf %82, %83 : vector<1x256xf32>
    %cst_45 = arith.constant dense<0.000000e+00> : vector<1x128xf32>
    %85 = tpu.matmul %84, %16, %cst_45 {dimension_numbers = #tpu.dot_dimension_numbers<[1], [0], [0], [1], [0, 0, 1, 1], [], []>} : vector<1x256xf32>, vector<256x128xf32>, vector<1x128xf32> -> vector<1x128xf32>
    %86 = arith.addf %85, %28 : vector<1x128xf32>
    %87 = arith.addf %80, %86 : vector<1x128xf32>
    %cst_46 = arith.constant dense<0.000000e+00> : vector<1x128xf32>
    %88 = tpu.matmul %87, %3, %cst_46 {dimension_numbers = #tpu.dot_dimension_numbers<[1], [0], [0], [1], [0, 0, 1, 1], [], []>} : vector<1x128xf32>, vector<128x128xf32>, vector<1x128xf32> -> vector<1x128xf32>
    %89 = arith.subf %87, %88 : vector<1x128xf32>
    %90 = arith.mulf %89, %89 : vector<1x128xf32>
    %cst_47 = arith.constant dense<0.000000e+00> : vector<1x128xf32>
    %91 = tpu.matmul %90, %3, %cst_47 {dimension_numbers = #tpu.dot_dimension_numbers<[1], [0], [0], [1], [0, 0, 1, 1], [], []>} : vector<1x128xf32>, vector<128x128xf32>, vector<1x128xf32> -> vector<1x128xf32>
    %cst_48 = arith.constant 9.99999974E-6 : f32
    %92 = vector.broadcast %cst_48 : f32 to vector<1x128xf32>
    %93 = arith.addf %91, %92 : vector<1x128xf32>
    %94 = math.rsqrt %93 : vector<1x128xf32>
    %95 = arith.mulf %89, %94 : vector<1x128xf32>
    %96 = arith.mulf %95, %29 : vector<1x128xf32>
    %97 = arith.addf %96, %30 : vector<1x128xf32>
    %c1_49 = arith.constant 1 : index
    %c0_50 = arith.constant 0 : index
    %c0_51 = arith.constant 0 : index
    %98 = vector.load %arg4[%c1_49, %c0_50, %c0_51] : memref<2x128x384xf32, #tpu.memory_space<vmem>>, vector<1x128x384xf32>
    %99 = vector.shape_cast %98 : vector<1x128x384xf32> to vector<128x384xf32>
    %c1_52 = arith.constant 1 : index
    %c0_53 = arith.constant 0 : index
    %c0_54 = arith.constant 0 : index
    %100 = vector.load %arg5[%c1_52, %c0_53, %c0_54] : memref<2x128x256xf32, #tpu.memory_space<vmem>>, vector<1x128x256xf32>
    %101 = vector.shape_cast %100 : vector<1x128x256xf32> to vector<128x256xf32>
    %c1_55 = arith.constant 1 : index
    %c0_56 = arith.constant 0 : index
    %c0_57 = arith.constant 0 : index
    %102 = vector.load %arg6[%c1_55, %c0_56, %c0_57] : memref<2x128x128xf32, #tpu.memory_space<vmem>>, vector<1x128x128xf32>
    %103 = vector.shape_cast %102 : vector<1x128x128xf32> to vector<128x128xf32>
    %c1_58 = arith.constant 1 : index
    %c0_59 = arith.constant 0 : index
    %c0_60 = arith.constant 0 : index
    %104 = vector.load %arg7[%c1_58, %c0_59, %c0_60] : memref<2x128x256xf32, #tpu.memory_space<vmem>>, vector<1x128x256xf32>
    %105 = vector.shape_cast %104 : vector<1x128x256xf32> to vector<128x256xf32>
    %c1_61 = arith.constant 1 : index
    %c0_62 = arith.constant 0 : index
    %c0_63 = arith.constant 0 : index
    %106 = vector.load %arg8[%c1_61, %c0_62, %c0_63] : memref<2x256x128xf32, #tpu.memory_space<vmem>>, vector<1x256x128xf32>
    %107 = vector.shape_cast %106 : vector<1x256x128xf32> to vector<256x128xf32>
    %c1_64 = arith.constant 1 : index
    %c0_65 = arith.constant 0 : index
    %c0_66 = arith.constant 0 : index
    %108 = vector.load %arg9[%c1_64, %c0_65, %c0_66] : memref<2x1x384xf32, #tpu.memory_space<vmem>>, vector<1x1x384xf32>
    %109 = vector.shape_cast %108 : vector<1x1x384xf32> to vector<1x384xf32>
    %c1_67 = arith.constant 1 : index
    %c0_68 = arith.constant 0 : index
    %c0_69 = arith.constant 0 : index
    %110 = vector.load %arg10[%c1_67, %c0_68, %c0_69] : memref<2x1x256xf32, #tpu.memory_space<vmem>>, vector<1x1x256xf32>
    %111 = vector.shape_cast %110 : vector<1x1x256xf32> to vector<1x256xf32>
    %c1_70 = arith.constant 1 : index
    %c0_71 = arith.constant 0 : index
    %c0_72 = arith.constant 0 : index
    %112 = vector.load %arg11[%c1_70, %c0_71, %c0_72] : memref<2x8x128xf32, #tpu.memory_space<vmem>>, vector<1x8x128xf32>
    %113 = vector.shape_cast %112 : vector<1x8x128xf32> to vector<8x128xf32>
    %114 = vector.extract_strided_slice %113 {offsets = [0, 0], sizes = [1, 128], strides = [1, 1]} : vector<8x128xf32> to vector<1x128xf32>
    %115 = vector.extract_strided_slice %113 {offsets = [1, 0], sizes = [1, 128], strides = [1, 1]} : vector<8x128xf32> to vector<1x128xf32>
    %116 = vector.extract_strided_slice %113 {offsets = [2, 0], sizes = [1, 128], strides = [1, 1]} : vector<8x128xf32> to vector<1x128xf32>
    %117 = vector.extract_strided_slice %113 {offsets = [3, 0], sizes = [1, 128], strides = [1, 1]} : vector<8x128xf32> to vector<1x128xf32>
    %118 = vector.extract_strided_slice %113 {offsets = [4, 0], sizes = [1, 128], strides = [1, 1]} : vector<8x128xf32> to vector<1x128xf32>
    %119 = vector.extract_strided_slice %113 {offsets = [5, 0], sizes = [1, 128], strides = [1, 1]} : vector<8x128xf32> to vector<1x128xf32>
    %120 = vector.extract_strided_slice %113 {offsets = [6, 0], sizes = [1, 128], strides = [1, 1]} : vector<8x128xf32> to vector<1x128xf32>
    %121 = vector.extract_strided_slice %113 {offsets = [7, 0], sizes = [1, 128], strides = [1, 1]} : vector<8x128xf32> to vector<1x128xf32>
    %cst_73 = arith.constant dense<0.000000e+00> : vector<1x384xf32>
    %122 = tpu.matmul %97, %99, %cst_73 {dimension_numbers = #tpu.dot_dimension_numbers<[1], [0], [0], [1], [0, 0, 1, 1], [], []>} : vector<1x128xf32>, vector<128x384xf32>, vector<1x384xf32> -> vector<1x384xf32>
    %123 = arith.addf %122, %109 : vector<1x384xf32>
    %124 = vector.extract_strided_slice %123 {offsets = [0, 0], sizes = [1, 128], strides = [1, 1]} : vector<1x384xf32> to vector<1x128xf32>
    %125 = vector.extract_strided_slice %123 {offsets = [0, 128], sizes = [1, 128], strides = [1, 1]} : vector<1x384xf32> to vector<1x128xf32>
    %126 = vector.extract_strided_slice %123 {offsets = [0, 256], sizes = [1, 128], strides = [1, 1]} : vector<1x384xf32> to vector<1x128xf32>
    %cst_74 = arith.constant dense<0.000000e+00> : vector<8x256xf32>
    %127 = tpu.matmul %5, %101, %cst_74 {dimension_numbers = #tpu.dot_dimension_numbers<[1], [0], [0], [1], [0, 0, 1, 1], [], []>} : vector<8x128xf32>, vector<128x256xf32>, vector<8x256xf32> -> vector<8x256xf32>
    %128 = vector.extract_strided_slice %127 {offsets = [0, 0], sizes = [8, 128], strides = [1, 1]} : vector<8x256xf32> to vector<8x128xf32>
    %129 = vector.broadcast %114 : vector<1x128xf32> to vector<8x128xf32>
    %130 = arith.addf %128, %129 : vector<8x128xf32>
    %131 = vector.extract_strided_slice %127 {offsets = [0, 128], sizes = [8, 128], strides = [1, 1]} : vector<8x256xf32> to vector<8x128xf32>
    %132 = vector.broadcast %115 : vector<1x128xf32> to vector<8x128xf32>
    %133 = arith.addf %131, %132 : vector<8x128xf32>
    %134 = vector.shape_cast %130 : vector<8x128xf32> to vector<1x8x128xf32>
    %135 = vector.shape_cast %133 : vector<8x128xf32> to vector<1x8x128xf32>
    %136 = arith.mulf %124, %125 : vector<1x128xf32>
    %cst_75 = arith.constant dense<0.000000e+00> : vector<1x128xf32>
    %137 = tpu.matmul %136, %1, %cst_75 {dimension_numbers = #tpu.dot_dimension_numbers<[1], [0], [0], [1], [0, 0, 1, 1], [], []>} : vector<1x128xf32>, vector<128x128xf32>, vector<1x128xf32> -> vector<1x128xf32>
    %138 = vector.shape_cast %124 : vector<1x128xf32> to vector<1x1x128xf32>
    %139 = vector.broadcast %138 : vector<1x1x128xf32> to vector<1x8x128xf32>
    %140 = arith.mulf %134, %139 : vector<1x8x128xf32>
    %141 = vector.shape_cast %140 : vector<1x8x128xf32> to vector<8x128xf32>
    %cst_76 = arith.constant dense<0.000000e+00> : vector<8x128xf32>
    %142 = tpu.matmul %141, %1, %cst_76 {dimension_numbers = #tpu.dot_dimension_numbers<[1], [0], [0], [1], [0, 0, 1, 1], [], []>} : vector<8x128xf32>, vector<128x128xf32>, vector<8x128xf32> -> vector<8x128xf32>
    %143 = vector.shape_cast %142 : vector<8x128xf32> to vector<1x8x128xf32>
    %cst_77 = arith.constant dense<0xFF800000> : vector<1x128xf32>
    %144 = vector.multi_reduction <maximumf>, %143, %cst_77 [1] : vector<1x8x128xf32> to vector<1x128xf32>
    %145 = arith.maximumf %137, %144 : vector<1x128xf32>
    %146 = arith.subf %137, %145 : vector<1x128xf32>
    %147 = math.exp %146 : vector<1x128xf32>
    %148 = vector.shape_cast %145 : vector<1x128xf32> to vector<1x1x128xf32>
    %149 = vector.broadcast %148 : vector<1x1x128xf32> to vector<1x8x128xf32>
    %150 = arith.subf %143, %149 : vector<1x8x128xf32>
    %151 = math.exp %150 : vector<1x8x128xf32>
    %cst_78 = arith.constant dense<0.000000e+00> : vector<1x128xf32>
    %152 = vector.multi_reduction <add>, %151, %cst_78 [1] : vector<1x8x128xf32> to vector<1x128xf32>
    %153 = arith.addf %147, %152 : vector<1x128xf32>
    %154 = arith.mulf %147, %126 : vector<1x128xf32>
    %155 = arith.mulf %151, %135 : vector<1x8x128xf32>
    %cst_79 = arith.constant dense<0.000000e+00> : vector<1x128xf32>
    %156 = vector.multi_reduction <add>, %155, %cst_79 [1] : vector<1x8x128xf32> to vector<1x128xf32>
    %157 = arith.addf %154, %156 : vector<1x128xf32>
    %158 = arith.divf %157, %153 : vector<1x128xf32>
    %cst_80 = arith.constant dense<0.000000e+00> : vector<1x128xf32>
    %159 = tpu.matmul %158, %103, %cst_80 {dimension_numbers = #tpu.dot_dimension_numbers<[1], [0], [0], [1], [0, 0, 1, 1], [], []>} : vector<1x128xf32>, vector<128x128xf32>, vector<1x128xf32> -> vector<1x128xf32>
    %160 = arith.addf %159, %116 : vector<1x128xf32>
    %161 = arith.addf %97, %160 : vector<1x128xf32>
    %cst_81 = arith.constant dense<0.000000e+00> : vector<1x128xf32>
    %162 = tpu.matmul %161, %3, %cst_81 {dimension_numbers = #tpu.dot_dimension_numbers<[1], [0], [0], [1], [0, 0, 1, 1], [], []>} : vector<1x128xf32>, vector<128x128xf32>, vector<1x128xf32> -> vector<1x128xf32>
    %163 = arith.subf %161, %162 : vector<1x128xf32>
    %164 = arith.mulf %163, %163 : vector<1x128xf32>
    %cst_82 = arith.constant dense<0.000000e+00> : vector<1x128xf32>
    %165 = tpu.matmul %164, %3, %cst_82 {dimension_numbers = #tpu.dot_dimension_numbers<[1], [0], [0], [1], [0, 0, 1, 1], [], []>} : vector<1x128xf32>, vector<128x128xf32>, vector<1x128xf32> -> vector<1x128xf32>
    %cst_83 = arith.constant 9.99999974E-6 : f32
    %166 = vector.broadcast %cst_83 : f32 to vector<1x128xf32>
    %167 = arith.addf %165, %166 : vector<1x128xf32>
    %168 = math.rsqrt %167 : vector<1x128xf32>
    %169 = arith.mulf %163, %168 : vector<1x128xf32>
    %170 = arith.mulf %169, %117 : vector<1x128xf32>
    %171 = arith.addf %170, %118 : vector<1x128xf32>
    %cst_84 = arith.constant dense<0.000000e+00> : vector<1x256xf32>
    %172 = tpu.matmul %171, %105, %cst_84 {dimension_numbers = #tpu.dot_dimension_numbers<[1], [0], [0], [1], [0, 0, 1, 1], [], []>} : vector<1x128xf32>, vector<128x256xf32>, vector<1x256xf32> -> vector<1x256xf32>
    %173 = arith.addf %172, %111 : vector<1x256xf32>
    %cst_85 = arith.constant 0.000000e+00 : f32
    %174 = vector.broadcast %cst_85 : f32 to vector<1x256xf32>
    %175 = arith.maximumf %173, %174 : vector<1x256xf32>
    %cst_86 = arith.constant dense<0.000000e+00> : vector<1x128xf32>
    %176 = tpu.matmul %175, %107, %cst_86 {dimension_numbers = #tpu.dot_dimension_numbers<[1], [0], [0], [1], [0, 0, 1, 1], [], []>} : vector<1x256xf32>, vector<256x128xf32>, vector<1x128xf32> -> vector<1x128xf32>
    %177 = arith.addf %176, %119 : vector<1x128xf32>
    %178 = arith.addf %171, %177 : vector<1x128xf32>
    %cst_87 = arith.constant dense<0.000000e+00> : vector<1x128xf32>
    %179 = tpu.matmul %178, %3, %cst_87 {dimension_numbers = #tpu.dot_dimension_numbers<[1], [0], [0], [1], [0, 0, 1, 1], [], []>} : vector<1x128xf32>, vector<128x128xf32>, vector<1x128xf32> -> vector<1x128xf32>
    %180 = arith.subf %178, %179 : vector<1x128xf32>
    %181 = arith.mulf %180, %180 : vector<1x128xf32>
    %cst_88 = arith.constant dense<0.000000e+00> : vector<1x128xf32>
    %182 = tpu.matmul %181, %3, %cst_88 {dimension_numbers = #tpu.dot_dimension_numbers<[1], [0], [0], [1], [0, 0, 1, 1], [], []>} : vector<1x128xf32>, vector<128x128xf32>, vector<1x128xf32> -> vector<1x128xf32>
    %cst_89 = arith.constant 9.99999974E-6 : f32
    %183 = vector.broadcast %cst_89 : f32 to vector<1x128xf32>
    %184 = arith.addf %182, %183 : vector<1x128xf32>
    %185 = math.rsqrt %184 : vector<1x128xf32>
    %186 = arith.mulf %180, %185 : vector<1x128xf32>
    %187 = arith.mulf %186, %120 : vector<1x128xf32>
    %188 = arith.addf %187, %121 : vector<1x128xf32>
    %c0_90 = arith.constant 0 : index
    %c0_91 = arith.constant 0 : index
    %189 = vector.load %arg12[%c0_90, %c0_91] : memref<1x128xf32, #tpu.memory_space<vmem>>, vector<1x128xf32>
    tpu.vector_store %arg12[%c0_90, %c0_91], %188 {strides = array<i32>} : memref<1x128xf32, #tpu.memory_space<vmem>>, vector<1x128xf32>,
    return
  }
  func.func @transform_0(%arg0: i32) -> (i32, i32) {
    %c0_i32 = arith.constant 0 : i32
    %c0_i32_0 = arith.constant 0 : i32
    return %arg0, %c0_i32 : i32, i32
  }
  func.func @transform_1(%arg0: i32) -> (i32, i32, i32) {
    %c0_i32 = arith.constant 0 : i32
    %c0_i32_0 = arith.constant 0 : i32
    %c0_i32_1 = arith.constant 0 : i32
    return %arg0, %c0_i32, %c0_i32_0 : i32, i32, i32
  }
  func.func @transform_2(%arg0: i32) -> (i32, i32, i32) {
    %c0_i32 = arith.constant 0 : i32
    %c0_i32_0 = arith.constant 0 : i32
    %c0_i32_1 = arith.constant 0 : i32
    %c0_i32_2 = arith.constant 0 : i32
    return %c0_i32, %c0_i32_0, %c0_i32_1 : i32, i32, i32
  }
  func.func @transform_3(%arg0: i32) -> (i32, i32, i32) {
    %c0_i32 = arith.constant 0 : i32
    %c0_i32_0 = arith.constant 0 : i32
    %c0_i32_1 = arith.constant 0 : i32
    %c0_i32_2 = arith.constant 0 : i32
    return %c0_i32, %c0_i32_0, %c0_i32_1 : i32, i32, i32
  }
  func.func @transform_4(%arg0: i32) -> (i32, i32, i32) {
    %c0_i32 = arith.constant 0 : i32
    %c0_i32_0 = arith.constant 0 : i32
    %c0_i32_1 = arith.constant 0 : i32
    %c0_i32_2 = arith.constant 0 : i32
    return %c0_i32, %c0_i32_0, %c0_i32_1 : i32, i32, i32
  }
  func.func @transform_5(%arg0: i32) -> (i32, i32, i32) {
    %c0_i32 = arith.constant 0 : i32
    %c0_i32_0 = arith.constant 0 : i32
    %c0_i32_1 = arith.constant 0 : i32
    %c0_i32_2 = arith.constant 0 : i32
    return %c0_i32, %c0_i32_0, %c0_i32_1 : i32, i32, i32
  }
  func.func @transform_6(%arg0: i32) -> (i32, i32, i32) {
    %c0_i32 = arith.constant 0 : i32
    %c0_i32_0 = arith.constant 0 : i32
    %c0_i32_1 = arith.constant 0 : i32
    %c0_i32_2 = arith.constant 0 : i32
    return %c0_i32, %c0_i32_0, %c0_i32_1 : i32, i32, i32
  }
  func.func @transform_7(%arg0: i32) -> (i32, i32, i32) {
    %c0_i32 = arith.constant 0 : i32
    %c0_i32_0 = arith.constant 0 : i32
    %c0_i32_1 = arith.constant 0 : i32
    %c0_i32_2 = arith.constant 0 : i32
    return %c0_i32, %c0_i32_0, %c0_i32_1 : i32, i32, i32
  }
  func.func @transform_8(%arg0: i32) -> (i32, i32, i32) {
    %c0_i32 = arith.constant 0 : i32
    %c0_i32_0 = arith.constant 0 : i32
    %c0_i32_1 = arith.constant 0 : i32
    %c0_i32_2 = arith.constant 0 : i32
    return %c0_i32, %c0_i32_0, %c0_i32_1 : i32, i32, i32
  }
  func.func @transform_9(%arg0: i32) -> (i32, i32, i32) {
    %c0_i32 = arith.constant 0 : i32
    %c0_i32_0 = arith.constant 0 : i32
    %c0_i32_1 = arith.constant 0 : i32
    %c0_i32_2 = arith.constant 0 : i32
    return %c0_i32, %c0_i32_0, %c0_i32_1 : i32, i32, i32
  }
  func.func @transform_10(%arg0: i32) -> (i32, i32, i32) {
    %c0_i32 = arith.constant 0 : i32
    %c0_i32_0 = arith.constant 0 : i32
    %c0_i32_1 = arith.constant 0 : i32
    %c0_i32_2 = arith.constant 0 : i32
    return %c0_i32, %c0_i32_0, %c0_i32_1 : i32, i32, i32
  }
  func.func @transform_11(%arg0: i32) -> (i32, i32) {
    %c0_i32 = arith.constant 0 : i32
    %c0_i32_0 = arith.constant 0 : i32
    return %arg0, %c0_i32 : i32, i32
  }
}

</mosaic_0001>

<bundles_post_ra>
// kernel: tpu_custom_call.1
= control target key start
LH: loop header
LB: loop body
LE: loop exit
PB: predicated region body
PF: predicated region fallthrough
CT: control target
= control target key end

     0   :  { %16 = vsyncpa [#allocation3], 0  ;;  %s4534_s0 = inlined_call_operand.hbm [shape: f32[1,128], index: 0, kind: input, shape index: {}]   ;;  %s4535_s1 = inlined_call_operand.hbm [shape: f32[1,8,128], index: 1, kind: input, shape index: {}]   ;;  %s4536_s2 = inlined_call_operand.hbm [shape: f32[2,128,128], index: 2, kind: input, shape index: {}]   ;;  %s4537_s3 = inlined_call_operand.hbm [shape: f32[2,128,384], index: 3, kind: input, shape index: {}]   ;;  %s4538_s4 = inlined_call_operand.hbm [shape: f32[2,128,256], index: 4, kind: input, shape index: {}]   ;;  %s4539_s5 = inlined_call_operand.hbm [shape: f32[2,128,128], index: 5, kind: input, shape index: {}]   ;;  %s4540_s6 = inlined_call_operand.hbm [shape: f32[2,128,256], index: 6, kind: input, shape index: {}]   ;;  %s4541_s7 = inlined_call_operand.hbm [shape: f32[2,256,128], index: 7, kind: input, shape index: {}]   ;;  %s4542_s8 = inlined_call_operand.hbm [shape: f32[2,1,384], index: 8, kind: input, shape index: {}]   ;;  %s4543_s9 = inlined_call_operand.hbm [shape: f32[2,1,256], index: 9, kind: input, shape index: {}]   ;;  %s4544_s10 = inlined_call_operand.vmem [shape: f32[2,8,128], index: 10, kind: input, shape index: {}]   ;;  %s4545_s11 = inlined_call_operand.hbm [shape: f32[1,128], index: 11, kind: output, shape index: {}]  }
   0x1   :  { %17 = vsyncpa [#allocation6], 0 }
   0x2   :  { %18 = vsyncpa [#allocation9], 0 }
   0x3   :  { %19 = vsyncpa [#allocation12], 0 }
   0x4   :  { %20 = vsyncpa [#allocation15], 0 }
   0x5   :  { %21 = vsyncpa [#allocation18], 0 }
   0x6   :  { %22 = vsyncpa [#allocation4], 0  ;;  %s3751_s17 = smov [#allocation5]   ;;  %s3752_s19 = smov [#allocation8]  }
   0x7   :  { %s39_s18 = sshll.u32 %s3751_s17, 4  ;;  %s60_s20 = sshll.u32 %s3752_s19, 4  ;;  %s40_s18 = int_to_ptr.vmem [resolvable:$true] %s39_s18  ;;  %s61_s20 = int_to_ptr.vmem [resolvable:$true] %s60_s20 }
   0x8   :  { %s3525_s21 = scalar_lea.vmem %s40_s18, 128  ;;  %p3530_p1 = scmp.lt.s32.totalorder %s40_s18, %s40_s18 }
   0x9   :  { %p3526_p0 = scmp.ne.s32.totalorder %s40_s18, %s3525_s21  ;;  %p3531_p2 = scmp.lt.s32.totalorder %s3525_s21, %s3525_s21 }
   0xb   :  { %p3532_p3 = por %p3531_p2, %p3530_p1 }
   0xd   :  { %p3533_p4 = pnand %p3532_p3, %p3526_p0 }
   0xf   :  { %3536 = shalt.err (!%p3533_p4)
}
  0x10   :  { %42 = dma.hbm_to_vmem [thread:$0]  %s4535_s1, 128, %s40_s18, [#allocation6]  }
  0x11   :  { %s3545_s24 = scalar_lea.vmem %s61_s20, 12288  ;;  %p3550_p6 = scmp.lt.s32.totalorder %s61_s20, %s61_s20 }
  0x12   :  { %p3546_p5 = scmp.ne.s32.totalorder %s61_s20, %s3545_s24  ;;  %p3551_p7 = scmp.lt.s32.totalorder %s3545_s24, %s3545_s24 }
  0x14   :  { %p3552_p8 = por %p3551_p7, %p3550_p6 }
  0x16   :  { %p3553_p9 = pnand %p3552_p8, %p3546_p5 }
  0x18   :  { %3556 = shalt.err (!%p3553_p9)
}
  0x19   :  { %s3753_s25 = smov 384   ;;  %s3754_s26 = smov 24  }
  0x1a   :  { %66 = dma.hbm_to_vmem [thread:$0]  %s4537_s3, 12288, %s61_s20, [#allocation9], %s3753_s25, %s3753_s25, %s3754_s26  }
  0x1b   :  { %s3755_s29 = smov [#allocation11]   ;;  %s3756_s12 = smov [#allocation14]  }
  0x1c   :  { %s84_s30 = sshll.u32 %s3755_s29, 4  ;;  %s108_s13 = sshll.u32 %s3756_s12, 4  ;;  %s85_s30 = int_to_ptr.vmem [resolvable:$true] %s84_s30  ;;  %s109_s13 = int_to_ptr.vmem [resolvable:$true] %s108_s13 }
  0x1d   :  { %s3565_s1 = scalar_lea.vmem %s85_s30, 4096  ;;  %p3570_p11 = scmp.lt.s32.totalorder %s85_s30, %s85_s30 }
  0x1e   :  { %p3566_p10 = scmp.ne.s32.totalorder %s85_s30, %s3565_s1  ;;  %p3571_p12 = scmp.lt.s32.totalorder %s3565_s1, %s3565_s1 }
  0x20   :  { %p3572_p13 = por %p3571_p12, %p3570_p11 }
  0x22   :  { %p3573_p0 = pnand %p3572_p13, %p3566_p10 }
  0x24   :  { %3576 = shalt.err (!%p3573_p0)
}
  0x25   :  { %s3757_s14 = smov 128   ;;  %s3758_s15 = smov 8  }
  0x26   :  { %90 = dma.hbm_to_vmem [thread:$0]  %s4539_s5, 4096, %s85_s30, [#allocation12], %s3757_s14, %s3757_s14, %s3758_s15  }
  0x27   :  { %s3585_s17 = scalar_lea.vmem %s109_s13, 8192  ;;  %p3590_p2 = scmp.lt.s32.totalorder %s109_s13, %s109_s13 }
  0x28   :  { %p3586_p1 = scmp.ne.s32.totalorder %s109_s13, %s3585_s17  ;;  %p3591_p3 = scmp.lt.s32.totalorder %s3585_s17, %s3585_s17 }
  0x2a   :  { %p3592_p4 = por %p3591_p3, %p3590_p2 }
  0x2c   :  { %p3593_p5 = pnand %p3592_p4, %p3586_p1 }
  0x2e   :  { %3596 = shalt.err (!%p3593_p5)
}
  0x2f   :  { %114 = dma.hbm_to_vmem [thread:$0]  %s4541_s7, 8192, %s109_s13, [#allocation15], %s3757_s14, %s3757_s14, %s3758_s15  }
  0x30   :  { %s3759_s20 = smov [#allocation2]   ;;  %s3760_s22 = smov [#allocation7]  }
  0x31   :  { %s29_s21 = sshll.u32 %s3759_s20, 4  ;;  %s48_s23 = sshll.u32 %s3760_s22, 4  ;;  %s30_s21 = int_to_ptr.vmem [resolvable:$true] %s29_s21  ;;  %s49_s23 = int_to_ptr.vmem [resolvable:$true] %s48_s23 }
  0x32   :  { %s3605_s5 = scalar_lea.vmem %s30_s21, 16  ;;  %s3609_s24 = scalar_lea.vmem %s30_s21, 32 }
  0x33   :  { %p3606_p6 = scmp.ne.s32.totalorder %s30_s21, %s3605_s5  ;;  %p3610_p7 = scmp.lt.s32.totalorder %s30_s21, %s30_s21 }
  0x34   :  { %p3611_p8 = scmp.lt.s32.totalorder %s3609_s24, %s3605_s5 }
  0x36   :  { %p3612_p9 = por %p3611_p8, %p3610_p7 }
  0x38   :  { %p3613_p10 = pnand %p3612_p9, %p3606_p6 }
  0x3a   :  { %3616 = shalt.err (!%p3613_p10)
}
  0x3b   :  { %32 = dma.hbm_to_vmem [thread:$0]  %s4534_s0, 16, %s30_s21, [#allocation3]  }
  0x3c   :  { %s3625_s27 = scalar_lea.vmem %s49_s23, 4096  ;;  %p3630_p12 = scmp.lt.s32.totalorder %s49_s23, %s49_s23 }
  0x3d   :  { %p3626_p11 = scmp.ne.s32.totalorder %s49_s23, %s3625_s27  ;;  %p3631_p13 = scmp.lt.s32.totalorder %s3625_s27, %s3625_s27 }
  0x3f   :  { %p3632_p0 = por %p3631_p13, %p3630_p12 }
  0x41   :  { %p3633_p1 = pnand %p3632_p0, %p3626_p11 }
  0x43   :  { %3636 = shalt.err (!%p3633_p1)
}
  0x44   :  { %54 = dma.hbm_to_vmem [thread:$0]  %s4536_s2, 4096, %s49_s23, [#allocation6], %s3757_s14, %s3757_s14, %s3758_s15  }
  0x45   :  { %s3761_s29 = smov [#allocation10]  }
  0x46   :  { %s72_s30 = sshll.u32 %s3761_s29, 4  ;;  %s73_s30 = int_to_ptr.vmem [resolvable:$true] %s72_s30 }
  0x47   :  { %s3645_s12 = scalar_lea.vmem %s73_s30, 8192  ;;  %p3650_p3 = scmp.lt.s32.totalorder %s73_s30, %s73_s30 }
  0x48   :  { %p3646_p2 = scmp.ne.s32.totalorder %s73_s30, %s3645_s12  ;;  %p3651_p4 = scmp.lt.s32.totalorder %s3645_s12, %s3645_s12 }
  0x4a   :  { %p3652_p5 = por %p3651_p4, %p3650_p3 }
  0x4c   :  { %p3653_p6 = pnand %p3652_p5, %p3646_p2 }
  0x4e   :  { %3656 = shalt.err (!%p3653_p6)
}
  0x4f   :  { %s3762_s0 = smov 256   ;;  %s3763_s13 = smov 16  }
  0x50   :  { %78 = dma.hbm_to_vmem [thread:$0]  %s4538_s4, 8192, %s73_s30, [#allocation9], %s3762_s0, %s3762_s0, %s3763_s13  }
  0x51   :  { %s3764_s3 = smov [#allocation13]   ;;  %s3765_s2 = smov [#allocation16]  }
  0x52   :  { %s96_s17 = sshll.u32 %s3764_s3, 4  ;;  %s120_s14 = sshll.u32 %s3765_s2, 4  ;;  %s97_s17 = int_to_ptr.vmem [resolvable:$true] %s96_s17  ;;  %s121_s14 = int_to_ptr.vmem [resolvable:$true] %s120_s14 }
  0x53   :  { %s3665_s15 = scalar_lea.vmem %s97_s17, 8192  ;;  %p3670_p8 = scmp.lt.s32.totalorder %s97_s17, %s97_s17 }
  0x54   :  { %p3666_p7 = scmp.ne.s32.totalorder %s97_s17, %s3665_s15  ;;  %p3671_p9 = scmp.lt.s32.totalorder %s3665_s15, %s3665_s15 }
  0x56   :  { %p3672_p10 = por %p3671_p9, %p3670_p8 }
  0x58   :  { %p3673_p11 = pnand %p3672_p10, %p3666_p7 }
  0x5a   :  { %3676 = shalt.err (!%p3673_p11)
}
  0x5b   :  { %102 = dma.hbm_to_vmem [thread:$0]  %s4540_s6, 8192, %s97_s17, [#allocation12], %s3762_s0, %s3762_s0, %s3763_s13  }
  0x5c   :  { %s3685_s20 = scalar_lea.vmem %s121_s14, 96  ;;  %p3690_p13 = scmp.lt.s32.totalorder %s121_s14, %s121_s14 }
  0x5d   :  { %p3686_p12 = scmp.ne.s32.totalorder %s121_s14, %s3685_s20  ;;  %p3691_p0 = scmp.lt.s32.totalorder %s3685_s20, %s3685_s20 }
  0x5f   :  { %p3692_p1 = por %p3691_p0, %p3690_p13 }
  0x61   :  { %p3693_p2 = pnand %p3692_p1, %p3686_p12 }
  0x63   :  { %3696 = shalt.err (!%p3693_p2)
}
  0x64   :  { %s3766_s4 = smov 48   ;;  %s3767_s21 = smov 3  }
  0x65   :  { %126 = dma.hbm_to_vmem [thread:$0]  %s4542_s8, 96, %s121_s14, [#allocation15], %s3766_s4, %s3766_s4, %s3767_s21  }
  0x66   :  { %s3768_s5 = smov [#allocation17]  }
  0x67   :  { %s132_s24 = sshll.u32 %s3768_s5, 4  ;;  %s133_s24 = int_to_ptr.vmem [resolvable:$true] %s132_s24 }
  0x68   :  { %s3705_s25 = scalar_lea.vmem %s133_s24, 64  ;;  %p3710_p4 = scmp.lt.s32.totalorder %s133_s24, %s133_s24 }
  0x69   :  { %p3706_p3 = scmp.ne.s32.totalorder %s133_s24, %s3705_s25  ;;  %p3711_p5 = scmp.lt.s32.totalorder %s3705_s25, %s3705_s25 }
  0x6b   :  { %p3712_p6 = por %p3711_p5, %p3710_p4 }
  0x6d   :  { %p3713_p7 = pnand %p3712_p6, %p3706_p3 }
  0x6f   :  { %3716 = shalt.err (!%p3713_p7)
}
  0x70   :  { %s3769_s6 = smov 32   ;;  %s3770_s26 = smov 2  }
  0x71   :  { %138 = dma.hbm_to_vmem [thread:$0]  %s4543_s9, 64, %s133_s24, [#allocation18], %s3769_s6, %s3769_s6, %s3770_s26  }
  0x72   :  { %3737 = dma.done.wait [#allocation3], 16  }
  0x73   :  { %3738 = vsyncadd [#allocation3], 4294967280 }
  0x74   :  { %3739 = dma.done.wait [#allocation6], 4224  }
  0x75   :  { %3740 = vsyncadd [#allocation6], 4294963072 }
  0x76   :  { %3741 = dma.done.wait [#allocation9], 20480  }
  0x77   :  { %3742 = vsyncadd [#allocation9], 4294946816 }
  0x78   :  { %3743 = dma.done.wait [#allocation12], 12288  }
  0x79   :  { %3744 = vsyncadd [#allocation12], 4294955008 }
  0x7a   :  { %3745 = dma.done.wait [#allocation15], 8288  }
  0x7b   :  { %3746 = vsyncadd [#allocation15], 4294959008 }
  0x7c   :  { %3747 = dma.done.wait [#allocation18], 64  }
  0x7d   :  { %3748 = vsyncadd [#allocation18], 4294967232  ;;  %v3771_v0 = vmov 0.0   ;;  %vm3772_vm0 = vmmov 0   ;;  %v252_v1 = vld [vmem:[#allocation8 + $0x170] sm:$0xff]  ;;  %v251_v2 = vld [vmem:[#allocation8 + $0x168] sm:$0xff] }
  0x7e   :  { %449 = vmatprep.mubr.f32.mxu0 %v3771_v0  ;;  %2878 = vmatprep.subr.mxu1 %v3771_v0  ;;  %v249_v3 = vld [vmem:[#allocation8 + $0x158] sm:$0xff]  ;;  %v248_v4 = vld [vmem:[#allocation8 + $0x150] sm:$0xff]  ;;  %v246_v5 = vld [vmem:[#allocation8 + $0x140] sm:$0xff] }
  0x7f   :  { %2910 = vmatprep.mubr.msk.f32.mxu1 %vm3772_vm0, %v3771_v0  ;;  %385 = vmatprep.subr.mxu0 %v252_v1  ;;  %v245_v6 = vld [vmem:[#allocation8 + $0x138] sm:$0xff]  ;;  %v243_v7 = vld [vmem:[#allocation8 + $0x128] sm:$0xff]  ;;  %v242_v8 = vld [vmem:[#allocation8 + $0x120] sm:$0xff] }
  0x80   :  { %386 = vmatpush1.msra.mxu0 %v251_v2  ;;  %v240_v9 = vld [vmem:[#allocation8 + $0x110] sm:$0xff]  ;;  %v239_v10 = vld [vmem:[#allocation8 + $0x108] sm:$0xff]  ;;  %v237_v11 = vld [vmem:[#allocation8 + $0xf8] sm:$0xff] }
  0x81   :  { %387 = vmatprep.subr.mxu0 %v249_v3  ;;  %v236_v12 = vld [vmem:[#allocation8 + $0xf0] sm:$0xff]  ;;  %v234_v13 = vld [vmem:[#allocation8 + $0xe0] sm:$0xff]  ;;  %v233_v14 = vld [vmem:[#allocation8 + $0xd8] sm:$0xff] }
  0x82   :  { %388 = vmatpush1.msra.mxu0 %v248_v4  ;;  %v231_v15 = vld [vmem:[#allocation8 + $0xc8] sm:$0xff]  ;;  %v230_v16 = vld [vmem:[#allocation8 + $0xc0] sm:$0xff]  ;;  %v228_v17 = vld [vmem:[#allocation8 + $0xb0] sm:$0xff] }
  0x83   :  { %389 = vmatprep.subr.mxu0 %v246_v5  ;;  %v227_v18 = vld [vmem:[#allocation8 + $0xa8] sm:$0xff]  ;;  %v225_v19 = vld [vmem:[#allocation8 + $0x98] sm:$0xff]  ;;  %v224_v20 = vld [vmem:[#allocation8 + $0x90] sm:$0xff] }
  0x84   :  { %390 = vmatpush1.msra.mxu0 %v245_v6  ;;  %v222_v21 = vld [vmem:[#allocation8 + $0x80] sm:$0xff]  ;;  %v221_v22 = vld [vmem:[#allocation8 + $0x78] sm:$0xff]  ;;  %v219_v23 = vld [vmem:[#allocation8 + $0x68] sm:$0xff] }
  0x85   :  { %391 = vmatprep.subr.mxu0 %v243_v7  ;;  %v218_v24 = vld [vmem:[#allocation8 + $0x60] sm:$0xff]  ;;  %v216_v25 = vld [vmem:[#allocation8 + $0x50] sm:$0xff]  ;;  %v253_v26 = vld [vmem:[#allocation8 + $0x178] sm:$0xff] }
  0x86   :  { %392 = vmatpush1.msra.mxu0 %v242_v8  ;;  %v250_v27 = vld [vmem:[#allocation8 + $0x160] sm:$0xff]  ;;  %v215_v28 = vld [vmem:[#allocation8 + $0x48] sm:$0xff]  ;;  %2879 = vmatpush3.msra.mxu1 %v253_v26  ;;  %v213_v29 = vld [vmem:[#allocation8 + $0x38] sm:$0xff] }
  0x87   :  { %393 = vmatprep.subr.mxu0 %v240_v9  ;;  %2880 = vmatprep.subr.mxu1 %v3771_v0  ;;  %v247_v30 = vld [vmem:[#allocation8 + $0x148] sm:$0xff]  ;;  %v212_v31 = vld [vmem:[#allocation8 + $0x30] sm:$0xff]  ;;  %v210_v32 = vld [vmem:[#allocation8 + $0x20] sm:$0xff] }
  0x88   :  { %394 = vmatpush1.msra.mxu0 %v239_v10  ;;  %2881 = vmatpush3.msra.mxu1 %v250_v27  ;;  %v244_v33 = vld [vmem:[#allocation8 + $0x130] sm:$0xff]  ;;  %v209_v34 = vld [vmem:[#allocation8 + $0x18] sm:$0xff]  ;;  %v207_v35 = vld [vmem:[#allocation8 + $0x8] sm:$0xff] }
  0x89   :  { %395 = vmatprep.subr.mxu0 %v237_v11  ;;  %2882 = vmatprep.subr.mxu1 %v3771_v0  ;;  %v241_v36 = vld [vmem:[#allocation8 + $0x118] sm:$0xff]  ;;  %v206_v37 = vld [vmem:[#allocation8] sm:$0xff]  ;;  %v3881_v38 = vld [vmem:[#allocation2] sm:$0x1] }
  0x8a   :  { %396 = vmatpush1.msra.mxu0 %v236_v12  ;;  %2883 = vmatpush3.msra.mxu1 %v247_v30  ;;  %v285_v39 = vld [vmem:[#allocation10 + $0xf8] sm:$0xff]  ;;  %v284_v40 = vld [vmem:[#allocation10 + $0xf0] sm:$0xff]  ;;  %v283_v41 = vld [vmem:[#allocation10 + $0xe8] sm:$0xff] }
  0x8b   :  { %397 = vmatprep.subr.mxu0 %v234_v13  ;;  %2884 = vmatprep.subr.mxu1 %v3771_v0  ;;  %v238_v42 = vld [vmem:[#allocation8 + $0x100] sm:$0xff]  ;;  %v281_v44 = vld [vmem:[#allocation10 + $0xd8] sm:$0xff]  ;;  %v235_v45 = vld [vmem:[#allocation8 + $0xe8] sm:$0xff] }
  0x8c   :  { %398 = vmatpush1.msra.mxu0 %v233_v14  ;;  %2885 = vmatpush3.msra.mxu1 %v244_v33  ;;  %v282_v43 = vld [vmem:[#allocation10 + $0xe0] sm:$0xff]  ;;  %v280_v46 = vld [vmem:[#allocation10 + $0xd0] sm:$0xff]  ;;  %v279_v47 = vld [vmem:[#allocation10 + $0xc8] sm:$0xff] }
  0x8d   :  { %399 = vmatprep.subr.mxu0 %v231_v15  ;;  %2886 = vmatprep.subr.mxu1 %v3771_v0  ;;  %v232_v48 = vld [vmem:[#allocation8 + $0xd0] sm:$0xff]  ;;  %v278_v49 = vld [vmem:[#allocation10 + $0xc0] sm:$0xff]  ;;  %v277_v50 = vld [vmem:[#allocation10 + $0xb8] sm:$0xff] }
  0x8e   :  { %400 = vmatpush1.msra.mxu0 %v230_v16  ;;  %2887 = vmatpush3.msra.mxu1 %v241_v36  ;;  %v229_v51 = vld [vmem:[#allocation8 + $0xb8] sm:$0xff]  ;;  %v276_v52 = vld [vmem:[#allocation10 + $0xb0] sm:$0xff]  ;;  %v275_v53 = vld [vmem:[#allocation10 + $0xa8] sm:$0xff]  ;;  %v370_v36 = vlaneseq }
  0x8f   :  { %401 = vmatprep.subr.mxu0 %v228_v17  ;;  %2888 = vmatprep.subr.mxu1 %v3771_v0  ;;  %v226_v54 = vld [vmem:[#allocation8 + $0xa0] sm:$0xff]  ;;  %v273_v56 = vld [vmem:[#allocation10 + $0x98] sm:$0xff]  ;;  %v223_v57 = vld [vmem:[#allocation8 + $0x88] sm:$0xff] }
  0x90   :  { %402 = vmatpush1.msra.mxu0 %v227_v18  ;;  %2889 = vmatpush3.msra.mxu1 %v238_v42  ;;  %v274_v55 = vld [vmem:[#allocation10 + $0xa0] sm:$0xff]  ;;  %v272_v58 = vld [vmem:[#allocation10 + $0x90] sm:$0xff]  ;;  %v271_v59 = vld [vmem:[#allocation10 + $0x88] sm:$0xff] }
  0x91   :  { %403 = vmatprep.subr.mxu0 %v225_v19  ;;  %2890 = vmatprep.subr.mxu1 %v3771_v0  ;;  %v220_v60 = vld [vmem:[#allocation8 + $0x70] sm:$0xff]  ;;  %v270_v61 = vld [vmem:[#allocation10 + $0x80] sm:$0xff]  ;;  %v269_v62 = vld [vmem:[#allocation10 + $0x78] sm:$0xff] }
  0x92   :  { %404 = vmatpush1.msra.mxu0 %v224_v20  ;;  %2891 = vmatpush3.msra.mxu1 %v235_v45  ;;  %v217_v63 = vld [vmem:[#allocation8 + $0x58] sm:$0xff]  ;;  %v268_v1 = vld [vmem:[#allocation10 + $0x70] sm:$0xff]  ;;  %v267_v2 = vld [vmem:[#allocation10 + $0x68] sm:$0xff] }
  0x93   :  { %405 = vmatprep.subr.mxu0 %v222_v21  ;;  %2892 = vmatprep.subr.mxu1 %v3771_v0  ;;  %v214_v3 = vld [vmem:[#allocation8 + $0x40] sm:$0xff]  ;;  %v265_v5 = vld [vmem:[#allocation10 + $0x58] sm:$0xff]  ;;  %v211_v6 = vld [vmem:[#allocation8 + $0x28] sm:$0xff] }
  0x94   :  { %406 = vmatpush1.msra.mxu0 %v221_v22  ;;  %2893 = vmatpush3.msra.mxu1 %v232_v48  ;;  %v266_v4 = vld [vmem:[#allocation10 + $0x60] sm:$0xff]  ;;  %v264_v7 = vld [vmem:[#allocation10 + $0x50] sm:$0xff]  ;;  %v263_v8 = vld [vmem:[#allocation10 + $0x48] sm:$0xff] }
  0x95   :  { %407 = vmatprep.subr.mxu0 %v219_v23  ;;  %2894 = vmatprep.subr.mxu1 %v3771_v0  ;;  %v208_v9 = vld [vmem:[#allocation8 + $0x10] sm:$0xff]  ;;  %v262_v10 = vld [vmem:[#allocation10 + $0x40] sm:$0xff]  ;;  %v261_v11 = vld [vmem:[#allocation10 + $0x38] sm:$0xff] }
  0x96   :  { %408 = vmatpush1.msra.mxu0 %v218_v24  ;;  %2895 = vmatpush3.msra.mxu1 %v229_v51  ;;  %v260_v12 = vld [vmem:[#allocation10 + $0x30] sm:$0xff]  ;;  %v186_v13 = vld [vmem:[#allocation7 + $0x78] sm:$0xff]  ;;  %v259_v14 = vld [vmem:[#allocation10 + $0x28] sm:$0xff] }
  0x97   :  { %409 = vmatprep.subr.mxu0 %v216_v25  ;;  %2896 = vmatprep.subr.mxu1 %v3771_v0  ;;  %v258_v15 = vld [vmem:[#allocation10 + $0x20] sm:$0xff]  ;;  %v185_v16 = vld [vmem:[#allocation7 + $0x70] sm:$0xff]  ;;  %v257_v17 = vld [vmem:[#allocation10 + $0x18] sm:$0xff] }
  0x98   :  { %410 = vmatpush1.msra.mxu0 %v215_v28  ;;  %2897 = vmatpush3.msra.mxu1 %v226_v54  ;;  %v256_v18 = vld [vmem:[#allocation10 + $0x10] sm:$0xff]  ;;  %v184_v19 = vld [vmem:[#allocation7 + $0x68] sm:$0xff]  ;;  %v254_v21 = vld [vmem:[#allocation10] sm:$0xff] }
  0x99   :  { %411 = vmatprep.subr.mxu0 %v213_v29  ;;  %2898 = vmatprep.subr.mxu1 %v3771_v0  ;;  %v255_v20 = vld [vmem:[#allocation10 + $0x8] sm:$0xff]  ;;  %v183_v22 = vld [vmem:[#allocation7 + $0x60] sm:$0xff]  ;;  %v204_v23 = vld [vmem:[#allocation5] sm:$0xff] }
  0x9a   :  { %412 = vmatpush1.msra.mxu0 %v212_v31  ;;  %2899 = vmatpush3.msra.mxu1 %v223_v57  ;;  %v182_v24 = vld [vmem:[#allocation7 + $0x58] sm:$0xff]  ;;  %v181_v25 = vld [vmem:[#allocation7 + $0x50] sm:$0xff]  ;;  %v180_v26 = vld [vmem:[#allocation7 + $0x48] sm:$0xff] }
  0x9b   :  { %413 = vmatprep.subr.mxu0 %v210_v32  ;;  %2900 = vmatprep.subr.mxu1 %v3771_v0  ;;  %v179_v27 = vld [vmem:[#allocation7 + $0x40] sm:$0xff]  ;;  %v178_v28 = vld [vmem:[#allocation7 + $0x38] sm:$0xff]  ;;  %v177_v29 = vld [vmem:[#allocation7 + $0x30] sm:$0xff] }
  0x9c   :  { %414 = vmatpush1.msra.mxu0 %v209_v34  ;;  %2901 = vmatpush3.msra.mxu1 %v220_v60  ;;  %v176_v30 = vld [vmem:[#allocation7 + $0x28] sm:$0xff]  ;;  %v175_v31 = vld [vmem:[#allocation7 + $0x20] sm:$0xff]  ;;  %v174_v32 = vld [vmem:[#allocation7 + $0x18] sm:$0xff] }
  0x9d   :  { %415 = vmatprep.subr.mxu0 %v207_v35  ;;  %2902 = vmatprep.subr.mxu1 %v3771_v0  ;;  %v173_v33 = vld [vmem:[#allocation7 + $0x10] sm:$0xff]  ;;  %v172_v34 = vld [vmem:[#allocation7 + $0x8] sm:$0xff]  ;;  %v171_v35 = vld [vmem:[#allocation7] sm:$0xff] }
  0x9e   :  { %416 = vmatpush1.msra.mxu0 %v206_v37  ;;  %2903 = vmatpush3.msra.mxu1 %v217_v63  ;;  %v3936_v37 = vshrl.u32 %v370_v36, 7  ;;  %v301_v57 = vld [vmem:[#allocation11 + $0x78] sm:$0xff]  ;;  %v298_v60 = vld [vmem:[#allocation11 + $0x60] sm:$0xff]  ;;  %v295_v63 = vld [vmem:[#allocation11 + $0x48] sm:$0xff] }
  0x9f   :  { %450 = vmatmul.mubr.f32.vlgmr.msra.gmra.mxu0 %v3881_v38  ;;  %526 = vmatprep.subr.mxu0 %v285_v39 }
  0xa0   :  { %527 = vmatpush1.msra.mxu0 %v284_v40  ;;  %590 = vmatprep.mubr.f32.mxu0 %v3771_v0  ;;  %v3939_v39 = vsub.s32 0, %v3936_v37  ;;  %v3941_v40 = vld [vmem:[#allocation16] sm:$0x7] }
  0xa1   :  { %528 = vmatprep.subr.mxu0 %v283_v41  ;;  %2904 = vmatprep.subr.mxu1 %v3771_v0  ;;  %v3944_v41 = vsub.s32 1, %v3936_v37 }
  0xa2   :  { %529 = vmatpush1.msra.mxu0 %v282_v43  ;;  %2905 = vmatpush3.msra.mxu1 %v214_v3  ;;  %v373_v42 = vrot.slane %v3941_v40, %v3939_v39  ;;  %v292_v3 = vld [vmem:[#allocation11 + $0x30] sm:$0xff] }
  0xa3   :  { %530 = vmatprep.subr.mxu0 %v281_v44  ;;  %2906 = vmatprep.subr.mxu1 %v3771_v0  ;;  %v377_v43 = vrot.slane %v3941_v40, %v3944_v41 }
  0xa4   :  { %531 = vmatpush1.msra.mxu0 %v280_v46  ;;  %2907 = vmatpush3.msra.mxu1 %v211_v6  ;;  %v289_v6 = vld [vmem:[#allocation11 + $0x18] sm:$0xff] }
  0xa5   :  { %532 = vmatprep.subr.mxu0 %v279_v47  ;;  %2908 = vmatprep.subr.mxu1 %v3771_v0 }
  0xa6   :  { %533 = vmatpush1.msra.mxu0 %v278_v49  ;;  %2909 = vmatpush3.msra.mxu1 %v208_v9  ;;  %v286_v9 = vld [vmem:[#allocation11] sm:$0xff] }
  0xa7   :  { %534 = vmatprep.subr.mxu0 %v277_v50  ;;  %2913 = vmatprep.subr.mxu1 %v3771_v0  ;;  %v3957_v50 = vld [vmem:[%s4544_s10] sm:$0xff] }
  0xa8   :  { %535 = vmatpush1.msra.mxu0 %v276_v52  ;;  %2911 = vmatmul.mubr.f32.vlgmr.msra.gmra.mxu1 %v3881_v38  ;;  %v600_v52 = vrot.slane %v3957_v50, %v3939_v39 }
  0xa9   :  { %536 = vmatprep.subr.mxu0 %v275_v53  ;;  %2914 = vmatpush3.msra.mxu1 %v186_v13 }
  0xaa   :  { %537 = vmatpush1.msra.mxu0 %v274_v55  ;;  %2915 = vmatprep.subr.mxu1 %v3771_v0 }
  0xab   :  { %538 = vmatprep.subr.mxu0 %v273_v56  ;;  %2916 = vmatpush3.msra.mxu1 %v185_v16 }
  0xac   :  { %539 = vmatpush1.msra.mxu0 %v272_v58  ;;  %2917 = vmatprep.subr.mxu1 %v3771_v0  ;;  %v300_v58 = vld [vmem:[#allocation11 + $0x70] sm:$0xff] }
  0xad   :  { %540 = vmatprep.subr.mxu0 %v271_v59  ;;  %2918 = vmatpush3.msra.mxu1 %v184_v19  ;;  %v299_v59 = vld [vmem:[#allocation11 + $0x68] sm:$0xff] }
  0xae   :  { %541 = vmatpush1.msra.mxu0 %v270_v61  ;;  %2919 = vmatprep.subr.mxu1 %v3771_v0  ;;  %v297_v61 = vld [vmem:[#allocation11 + $0x58] sm:$0xff] }
  0xaf   :  { %542 = vmatprep.subr.mxu0 %v269_v62  ;;  %2920 = vmatpush3.msra.mxu1 %v183_v22  ;;  %v296_v62 = vld [vmem:[#allocation11 + $0x50] sm:$0xff] }
  0xb0   :  { %543 = vmatpush1.msra.mxu0 %v268_v1  ;;  %2921 = vmatprep.subr.mxu1 %v3771_v0  ;;  %v294_v1 = vld [vmem:[#allocation11 + $0x40] sm:$0xff] }
  0xb1   :  { %544 = vmatprep.subr.mxu0 %v267_v2  ;;  %2922 = vmatpush3.msra.mxu1 %v182_v24  ;;  %v293_v2 = vld [vmem:[#allocation11 + $0x38] sm:$0xff] }
  0xb2   :  { %545 = vmatpush1.msra.mxu0 %v266_v4  ;;  %2923 = vmatprep.subr.mxu1 %v3771_v0  ;;  %v291_v4 = vld [vmem:[#allocation11 + $0x28] sm:$0xff] }
  0xb3   :  { %546 = vmatprep.subr.mxu0 %v265_v5  ;;  %2945 = vmatprep.mubr.msk.f32.mxu1 %vm3772_vm0, %v3771_v0  ;;  %v290_v5 = vld [vmem:[#allocation11 + $0x20] sm:$0xff] }
  0xb4   :  { %547 = vmatpush1.msra.mxu0 %v264_v7  ;;  %2924 = vmatpush3.msra.mxu1 %v181_v25  ;;  %v288_v7 = vld [vmem:[#allocation11 + $0x10] sm:$0xff] }
  0xb5   :  { %548 = vmatprep.subr.mxu0 %v263_v8  ;;  %2925 = vmatprep.subr.mxu1 %v3771_v0  ;;  %v287_v8 = vld [vmem:[#allocation11 + $0x8] sm:$0xff] }
  0xb6   :  { %549 = vmatpush1.msra.mxu0 %v262_v10  ;;  %2926 = vmatpush3.msra.mxu1 %v180_v26  ;;  %v3980_v10 = vld [vmem:[#allocation7 + $0xf8] sm:$0xff] }
  0xb7   :  { %550 = vmatprep.subr.mxu0 %v261_v11  ;;  %2927 = vmatprep.subr.mxu1 %v3771_v0  ;;  %v3982_v11 = vld [vmem:[#allocation7 + $0xf0] sm:$0xff] }
  0xb8   :  { %551 = vmatpush1.msra.mxu0 %v260_v12  ;;  %2928 = vmatpush3.msra.mxu1 %v179_v27  ;;  %v3986_v12 = vld [vmem:[#allocation7 + $0xe8] sm:$0xff] }
  0xb9   :  { %552 = vmatprep.subr.mxu0 %v259_v14  ;;  %2929 = vmatprep.subr.mxu1 %v3771_v0  ;;  %v3994_v14 = vld [vmem:[#allocation7 + $0xd8] sm:$0xff] }
  0xba   :  { %553 = vmatpush1.msra.mxu0 %v258_v15  ;;  %2930 = vmatpush3.msra.mxu1 %v178_v28  ;;  %v3998_v15 = vld [vmem:[#allocation7 + $0xd0] sm:$0xff] }
  0xbb   :  { %554 = vmatprep.subr.mxu0 %v257_v17  ;;  %2931 = vmatprep.subr.mxu1 %v3771_v0  ;;  %v4006_v17 = vld [vmem:[#allocation7 + $0xc0] sm:$0xff] }
  0xbc   :  { %555 = vmatpush1.msra.mxu0 %v256_v18  ;;  %2932 = vmatpush3.msra.mxu1 %v177_v29  ;;  %v4010_v18 = vld [vmem:[#allocation7 + $0xb8] sm:$0xff] }
  0xbd   :  { %556 = vmatprep.subr.mxu0 %v255_v20  ;;  %2933 = vmatprep.subr.mxu1 %v3771_v0  ;;  %v4018_v20 = vld [vmem:[#allocation7 + $0xa8] sm:$0xff] }
  0xbe   :  { %557 = vmatpush1.msra.mxu0 %v254_v21  ;;  %2934 = vmatpush3.msra.mxu1 %v176_v30  ;;  %v4022_v21 = vld [vmem:[#allocation7 + $0xa0] sm:$0xff] }
  0xbf   :  { %591 = vmatmul.mubr.f32.vlgmr.msra.gmra.mxu0 %v204_v23  ;;  %2948 = vmatprep.subr.mxu0 %v3771_v0 }
  0xc0   :  { %2949 = vmatpush3.msra.mxu0 %v186_v13  ;;  %2935 = vmatprep.subr.mxu1 %v3771_v0  ;;  %v3990_v13 = vld [vmem:[#allocation7 + $0xe0] sm:$0xff] }
  0xc1   :  { %2950 = vmatprep.subr.mxu0 %v3771_v0  ;;  %2936 = vmatpush3.msra.mxu1 %v175_v31 }
  0xc2   :  { %2951 = vmatpush3.msra.mxu0 %v185_v16  ;;  %2937 = vmatprep.subr.mxu1 %v3771_v0  ;;  %v4002_v16 = vld [vmem:[#allocation7 + $0xc8] sm:$0xff] }
  0xc3   :  { %2952 = vmatprep.subr.mxu0 %v3771_v0  ;;  %2980 = vmatprep.mubr.msk.f32.mxu0 %vm3772_vm0, %v3771_v0 }
  0xc4   :  { %2953 = vmatpush3.msra.mxu0 %v184_v19  ;;  %2938 = vmatpush3.msra.mxu1 %v174_v32  ;;  %v4014_v19 = vld [vmem:[#allocation7 + $0xb0] sm:$0xff] }
  0xc5   :  { %2954 = vmatprep.subr.mxu0 %v3771_v0  ;;  %2939 = vmatprep.subr.mxu1 %v3771_v0 }
  0xc6   :  { %2955 = vmatpush3.msra.mxu0 %v183_v22  ;;  %2940 = vmatpush3.msra.mxu1 %v173_v33  ;;  %v4026_v22 = vld [vmem:[#allocation7 + $0x98] sm:$0xff] }
  0xc7   :  { %2956 = vmatprep.subr.mxu0 %v3771_v0  ;;  %2941 = vmatprep.subr.mxu1 %v3771_v0 }
  0xc8   :  { %2957 = vmatpush3.msra.mxu0 %v182_v24  ;;  %2942 = vmatpush3.msra.mxu1 %v172_v34 }
  0xc9   :  { %2958 = vmatprep.subr.mxu0 %v3771_v0  ;;  %2943 = vmatprep.subr.mxu1 %v3771_v0 }
  0xca   :  { %2959 = vmatpush3.msra.mxu0 %v181_v25  ;;  %2944 = vmatpush3.msra.mxu1 %v171_v35 }
  0xcb   :  { %2960 = vmatprep.subr.mxu0 %v3771_v0  ;;  %2983 = vmatprep.subr.mxu1 %v3771_v0 }
  0xcc   :  { %2961 = vmatpush3.msra.mxu0 %v180_v26 }
  0xcd   :  { %2962 = vmatprep.subr.mxu0 %v3771_v0 }
  0xce   :  { %2963 = vmatpush3.msra.mxu0 %v179_v27 }
  0xcf   :  { %2964 = vmatprep.subr.mxu0 %v3771_v0 }
  0xd0   :  { %2965 = vmatpush3.msra.mxu0 %v178_v28 }
  0xd1   :  { %2966 = vmatprep.subr.mxu0 %v3771_v0 }
  0xd2   :  { %2967 = vmatpush3.msra.mxu0 %v177_v29 }
  0xd3   :  { %2968 = vmatprep.subr.mxu0 %v3771_v0 }
  0xd4   :  { %2969 = vmatpush3.msra.mxu0 %v176_v30 }
  0xd5   :  { %2970 = vmatprep.subr.mxu0 %v3771_v0 }
  0xd6   :  { %2971 = vmatpush3.msra.mxu0 %v175_v31 }
  0xd7   :  { %2972 = vmatprep.subr.mxu0 %v3771_v0 }
  0xd8   :  { %2973 = vmatpush3.msra.mxu0 %v174_v32 }
  0xd9   :  { %2974 = vmatprep.subr.mxu0 %v3771_v0 }
  0xda   :  { %2975 = vmatpush3.msra.mxu0 %v173_v33 }
  0xdb   :  { %2976 = vmatprep.subr.mxu0 %v3771_v0 }
  0xdc   :  { %2977 = vmatpush3.msra.mxu0 %v172_v34 }
  0xdd   :  { %2978 = vmatprep.subr.mxu0 %v3771_v0 }
  0xde   :  { %2979 = vmatpush3.msra.mxu0 %v171_v35 }
  0xdf   :  { %3018 = vmatprep.subr.mxu0 %v3771_v0 }
 0x15f   :  { %v451_v44 = vpop.f32.mrf.mxu0 }
 0x160   :  { %v452_v45 = vadd.f32 %v451_v44, %v373_v42  ;;  %v605_v44 = vrot.slane %v3957_v50, %v3944_v41 }
 0x161   :  { %v453_v46 = vpop.f32.mrf.mxu0 }
 0x162   :  { %v454_v47 = vadd.f32 %v453_v46, %v377_v43  ;;  %v681_v54 = vrot.slane %v452_v45, %v3939_v39 }
 0x164   :  { %v607_v48 = vmul.f32 %v454_v47, %v452_v45 }
 0x166   :  { %2946 = vmatmul.mubr.f32.vlgmr.msra.gmra.mxu1 %v607_v48 }
 0x167   :  { %3015 = vmatprep.mubr.msk.f32.mxu1 %vm3772_vm0, %v3771_v0  ;;  %2984 = vmatpush3.msra.mxu1 %v301_v57 }
 0x168   :  { %v3952_v49 = vpop.f32.mrf.mxu1  ;;  %2985 = vmatprep.subr.mxu1 %v3771_v0 }
 0x169   :  { %2986 = vmatpush3.msra.mxu1 %v300_v58 }
 0x16a   :  { %v2912_v51 = vpop.f32.mrf.mxu1  ;;  %2987 = vmatprep.subr.mxu1 %v3771_v0 }
 0x16b   :  { %2988 = vmatpush3.msra.mxu1 %v299_v59 }
 0x16c   :  { %2989 = vmatprep.subr.mxu1 %v3771_v0 }
 0x16d   :  { %2990 = vmatpush3.msra.mxu1 %v298_v60 }
 0x16e   :  { %2991 = vmatprep.subr.mxu1 %v3771_v0 }
 0x16f   :  { %2992 = vmatpush3.msra.mxu1 %v297_v61 }
 0x170   :  { %2993 = vmatprep.subr.mxu1 %v3771_v0 }
 0x171   :  { %2994 = vmatpush3.msra.mxu1 %v296_v62  ;;  %v380_v62 = vsub.s32 2, %v3936_v37 }
 0x172   :  { %2995 = vmatprep.subr.mxu1 %v3771_v0 }
 0x173   :  { %2996 = vmatpush3.msra.mxu1 %v295_v63 }
 0x174   :  { %2997 = vmatprep.subr.mxu1 %v3771_v0 }
 0x175   :  { %2998 = vmatpush3.msra.mxu1 %v294_v1  ;;  %v381_v1 = vrot.slane %v3941_v40, %v380_v62  ;;  %v4068_v40 = vld [vmem:[#allocation7 + $0x90] sm:$0xff] }
 0x176   :  { %2999 = vmatprep.subr.mxu1 %v3771_v0 }
 0x177   :  { %3000 = vmatpush3.msra.mxu1 %v293_v2 }
 0x178   :  { %3001 = vmatprep.subr.mxu1 %v3771_v0 }
 0x179   :  { %3002 = vmatpush3.msra.mxu1 %v292_v3  ;;  %v523_v3 = vadd.f32 %v3952_v49, %v381_v1  ;;  %v4073_v49 = vld [vmem:[#allocation7 + $0x88] sm:$0xff]  ;;  %v308_v1 = vld [vmem:[#allocation13 + $0x30] sm:$0xff] }
 0x17a   :  { %3003 = vmatprep.subr.mxu1 %v3771_v0 }
 0x17b   :  { %3004 = vmatpush3.msra.mxu1 %v291_v4 }
 0x17c   :  { %3005 = vmatprep.subr.mxu1 %v3771_v0 }
 0x17d   :  { %3006 = vmatpush3.msra.mxu1 %v290_v5 }
 0x17e   :  { %3007 = vmatprep.subr.mxu1 %v3771_v0 }
 0x17f   :  { %v592_v53 = vpop.f32.mrf.mxu0  ;;  %3008 = vmatpush3.msra.mxu1 %v289_v6 }
 0x180   :  { %v601_v55 = vadd.f32 %v600_v52, %v592_v53  ;;  %3009 = vmatprep.subr.mxu1 %v3771_v0 }
 0x181   :  { %3010 = vmatpush3.msra.mxu1 %v288_v7  ;;  %v594_v25 = vpop.f32.mrf.mxu0 }
 0x182   :  { %v682_v56 = vmul.f32 %v681_v54, %v601_v55  ;;  %3011 = vmatprep.subr.mxu1 %v3771_v0  ;;  %v606_v46 = vadd.f32 %v605_v44, %v594_v25 }
 0x183   :  { %3012 = vmatpush3.msra.mxu1 %v287_v8 }
 0x184   :  { %2981 = vmatmul.mubr.f32.vlgmr.msra.gmra.mxu0 %v682_v56  ;;  %3013 = vmatprep.subr.mxu1 %v3771_v0 }
 0x185   :  { %3050 = vmatprep.mubr.msk.f32.mxu0 %vm3772_vm0, %v3771_v0  ;;  %3014 = vmatpush3.msra.mxu1 %v286_v9  ;;  %v4079_v9 = vld [vmem:[#allocation7 + $0x80] sm:$0xff] }
 0x186   :  { %3053 = vmatprep.subr.mxu1 %v3771_v0  ;;  %3019 = vmatpush3.msra.mxu0 %v3980_v10 }
 0x187   :  { %3020 = vmatprep.subr.mxu0 %v3771_v0 }
 0x188   :  { %3021 = vmatpush3.msra.mxu0 %v3982_v11 }
 0x189   :  { %3022 = vmatprep.subr.mxu0 %v3771_v0 }
 0x18a   :  { %3023 = vmatpush3.msra.mxu0 %v3986_v12 }
 0x18b   :  { %3024 = vmatprep.subr.mxu0 %v3771_v0 }
 0x18c   :  { %3025 = vmatpush3.msra.mxu0 %v3990_v13 }
 0x18d   :  { %3026 = vmatprep.subr.mxu0 %v3771_v0 }
 0x18e   :  { %3027 = vmatpush3.msra.mxu0 %v3994_v14 }
 0x18f   :  { %3028 = vmatprep.subr.mxu0 %v3771_v0 }
 0x190   :  { %3029 = vmatpush3.msra.mxu0 %v3998_v15 }
 0x191   :  { %3030 = vmatprep.subr.mxu0 %v3771_v0 }
 0x192   :  { %3031 = vmatpush3.msra.mxu0 %v4002_v16 }
 0x193   :  { %3032 = vmatprep.subr.mxu0 %v3771_v0 }
 0x194   :  { %3033 = vmatpush3.msra.mxu0 %v4006_v17 }
 0x195   :  { %3034 = vmatprep.subr.mxu0 %v3771_v0 }
 0x196   :  { %3035 = vmatpush3.msra.mxu0 %v4010_v18 }
 0x197   :  { %3036 = vmatprep.subr.mxu0 %v3771_v0 }
 0x198   :  { %3037 = vmatpush3.msra.mxu0 %v4014_v19 }
 0x199   :  { %3038 = vmatprep.subr.mxu0 %v3771_v0 }
 0x19a   :  { %3039 = vmatpush3.msra.mxu0 %v4018_v20 }
 0x19b   :  { %3040 = vmatprep.subr.mxu0 %v3771_v0 }
 0x19c   :  { %3041 = vmatpush3.msra.mxu0 %v4022_v21 }
 0x19d   :  { %3042 = vmatprep.subr.mxu0 %v3771_v0 }
 0x19e   :  { %3043 = vmatpush3.msra.mxu0 %v4026_v22 }
 0x19f   :  { %3044 = vmatprep.subr.mxu0 %v3771_v0 }
 0x1a0   :  { %3045 = vmatpush3.msra.mxu0 %v4068_v40 }
 0x1a1   :  { %3046 = vmatprep.subr.mxu0 %v3771_v0 }
 0x1a2   :  { %3047 = vmatpush3.msra.mxu0 %v4073_v49 }
 0x1a3   :  { %3048 = vmatprep.subr.mxu0 %v3771_v0 }
 0x1a4   :  { %3049 = vmatpush3.msra.mxu0 %v4079_v9 }
 0x226   :  { %v674_v23 = vpop.f32.mrf.mxu1 }
 0x228   :  { %v2947_v24 = vpop.f32.mrf.mxu1 }
 0x244   :  { %v749_v26 = vpop.f32.mrf.mxu0 }
 0x245   :  { %v753_v27 = vrot.slane %v749_v26, 4 }
 0x246   :  { %v2982_v28 = vpop.f32.mrf.mxu0 }
 0x247   :  { %v754_v29 = vmax.f32 %v749_v26, %v753_v27  ;;  %v333_v28 = vld [vmem:[#allocation13 + $0xf8] sm:$0xff] }
 0x248   :  { %1052 = vmatprep.subr.mxu0 %v333_v28  ;;  %v362_v28 = vld [vmem:[#allocation14 + $0xe0] sm:$0xff] }
 0x249   :  { %v755_v30 = vrot.slane %v754_v29, 2 }
 0x24b   :  { %v756_v31 = vmax.f32 %v754_v29, %v755_v30  ;;  %v332_v29 = vld [vmem:[#allocation13 + $0xf0] sm:$0xff]  ;;  %v331_v30 = vld [vmem:[#allocation13 + $0xe8] sm:$0xff] }
 0x24d   :  { %v757_v32 = vrot.slane %v756_v31, 1 }
 0x24f   :  { %v758_v33 = vmax.f32 %v756_v31, %v757_v32  ;;  %v330_v31 = vld [vmem:[#allocation13 + $0xe0] sm:$0xff]  ;;  %v329_v32 = vld [vmem:[#allocation13 + $0xd8] sm:$0xff] }
 0x251   :  { %v759_v34 = vmax.f32 %v674_v23, %v758_v33  ;;  %v328_v33 = vld [vmem:[#allocation13 + $0xd0] sm:$0xff] }
 0x253   :  { %v766_v35 = vrot.slane %v759_v34, %v3939_v39  ;;  %v760_v43 = vsub.f32 %v674_v23, %v759_v34  ;;  %v789_v23 = vrot.slane %v3957_v50, 2  ;;  %v327_v34 = vld [vmem:[#allocation13 + $0xc8] sm:$0xff] }
 0x255   :  { %v767_v36 = vsub.f32 %v749_v26, %v766_v35  ;;  %v761_v45 = vmul.f32 1.442695, %v760_v43  ;;  %v326_v35 = vld [vmem:[#allocation13 + $0xc0] sm:$0xff] }
 0x257   :  { %v768_v42 = vmul.f32 1.442695, %v767_v36  ;;  %v325_v36 = vld [vmem:[#allocation13 + $0xb8] sm:$0xff] }
 0x259   :  { %3464 = vpow2.f32 %v768_v42 }
 0x25a   :  { %3466 = vpow2.f32 %v761_v45  ;;  %v324_v45 = vld [vmem:[#allocation13 + $0xb0] sm:$0xff] }
 0x266   :  { %v3465_v47 = vpop.eup %3464 }
 0x267   :  { %v770_v48 = vrot.slane %v3465_v47, 4  ;;  %v778_v51 = vmul.f32 %v3465_v47, %v606_v46  ;;  %v3467_v60 = vpop.eup %3466  ;;  %v323_v46 = vld [vmem:[#allocation13 + $0xa8] sm:$0xff] }
 0x268   :  { %v777_v5 = vmul.f32 %v3467_v60, %v523_v3  ;;  %v306_v3 = vld [vmem:[#allocation13 + $0x20] sm:$0xff] }
 0x269   :  { %v771_v52 = vadd.f32 %v3465_v47, %v770_v48  ;;  %v779_v53 = vrot.slane %v778_v51, 4  ;;  %v322_v47 = vld [vmem:[#allocation13 + $0xa0] sm:$0xff]  ;;  %v321_v48 = vld [vmem:[#allocation13 + $0x98] sm:$0xff] }
 0x26b   :  { %v772_v54 = vrot.slane %v771_v52, 2  ;;  %v780_v56 = vadd.f32 %v779_v53, %v778_v51  ;;  %v320_v51 = vld [vmem:[#allocation13 + $0x90] sm:$0xff]  ;;  %v318_v53 = vld [vmem:[#allocation13 + $0x80] sm:$0xff] }
 0x26d   :  { %v773_v55 = vadd.f32 %v772_v54, %v771_v52  ;;  %v781_v59 = vrot.slane %v780_v56, 2  ;;  %v319_v52 = vld [vmem:[#allocation13 + $0x88] sm:$0xff]  ;;  %v317_v54 = vld [vmem:[#allocation13 + $0x78] sm:$0xff] }
 0x26f   :  { %v774_v57 = vrot.slane %v773_v55, 1  ;;  %v782_v63 = vadd.f32 %v781_v59, %v780_v56  ;;  %v315_v56 = vld [vmem:[#allocation13 + $0x68] sm:$0xff]  ;;  %v312_v59 = vld [vmem:[#allocation13 + $0x50] sm:$0xff] }
 0x271   :  { %v775_v58 = vadd.f32 %v774_v57, %v773_v55  ;;  %v783_v2 = vrot.slane %v782_v63, 1  ;;  %v316_v55 = vld [vmem:[#allocation13 + $0x70] sm:$0xff]  ;;  %v314_v57 = vld [vmem:[#allocation13 + $0x60] sm:$0xff] }
 0x273   :  { %v776_v61 = vadd.f32 %v3467_v60, %v775_v58  ;;  %v784_v4 = vadd.f32 %v783_v2, %v782_v63  ;;  %v313_v58 = vld [vmem:[#allocation13 + $0x58] sm:$0xff]  ;;  %v311_v60 = vld [vmem:[#allocation13 + $0x48] sm:$0xff] }
 0x274   :  { %v309_v63 = vld [vmem:[#allocation13 + $0x38] sm:$0xff]  ;;  %v307_v2 = vld [vmem:[#allocation13 + $0x28] sm:$0xff] }
 0x275   :  { %3468 = vrcp.f32 %v776_v61  ;;  %v785_v6 = vadd.f32 %v784_v4, %v777_v5  ;;  %v310_v61 = vld [vmem:[#allocation13 + $0x40] sm:$0xff]  ;;  %v305_v4 = vld [vmem:[#allocation13 + $0x18] sm:$0xff]  ;;  %v304_v5 = vld [vmem:[#allocation13 + $0x10] sm:$0xff] }
 0x282   :  { %v3469_v7 = vpop.eup %3468 }
 0x283   :  { %v787_v8 = vmul.f32 %v3469_v7, %v785_v6  ;;  %v303_v6 = vld [vmem:[#allocation13 + $0x8] sm:$0xff]  ;;  %v302_v7 = vld [vmem:[#allocation13] sm:$0xff] }
 0x285   :  { %3016 = vmatmul.mubr.f32.vlgmr.msra.gmra.mxu1 %v787_v8  ;;  %v365_v8 = vld [vmem:[#allocation14 + $0xf8] sm:$0xff] }
 0x286   :  { %3054 = vmatpush3.msra.mxu1 %v3980_v10  ;;  %3085 = vmatprep.mubr.msk.f32.mxu1 %vm3772_vm0, %v3771_v0 }
 0x287   :  { %3055 = vmatprep.subr.mxu1 %v3771_v0 }
 0x288   :  { %3056 = vmatpush3.msra.mxu1 %v3982_v11 }
 0x289   :  { %3057 = vmatprep.subr.mxu1 %v3771_v0 }
 0x28a   :  { %3058 = vmatpush3.msra.mxu1 %v3986_v12 }
 0x28b   :  { %3059 = vmatprep.subr.mxu1 %v3771_v0 }
 0x28c   :  { %3060 = vmatpush3.msra.mxu1 %v3990_v13 }
 0x28d   :  { %3061 = vmatprep.subr.mxu1 %v3771_v0 }
 0x28e   :  { %3062 = vmatpush3.msra.mxu1 %v3994_v14 }
 0x28f   :  { %3063 = vmatprep.subr.mxu1 %v3771_v0 }
 0x290   :  { %3064 = vmatpush3.msra.mxu1 %v3998_v15 }
 0x291   :  { %3065 = vmatprep.subr.mxu1 %v3771_v0 }
 0x292   :  { %3066 = vmatpush3.msra.mxu1 %v4002_v16 }
 0x293   :  { %3067 = vmatprep.subr.mxu1 %v3771_v0 }
 0x294   :  { %3068 = vmatpush3.msra.mxu1 %v4006_v17 }
 0x295   :  { %3069 = vmatprep.subr.mxu1 %v3771_v0 }
 0x296   :  { %3070 = vmatpush3.msra.mxu1 %v4010_v18 }
 0x297   :  { %3071 = vmatprep.subr.mxu1 %v3771_v0 }
 0x298   :  { %3072 = vmatpush3.msra.mxu1 %v4014_v19 }
 0x299   :  { %3073 = vmatprep.subr.mxu1 %v3771_v0 }
 0x29a   :  { %3074 = vmatpush3.msra.mxu1 %v4018_v20 }
 0x29b   :  { %3075 = vmatprep.subr.mxu1 %v3771_v0 }
 0x29c   :  { %3076 = vmatpush3.msra.mxu1 %v4022_v21 }
 0x29d   :  { %3077 = vmatprep.subr.mxu1 %v3771_v0 }
 0x29e   :  { %3078 = vmatpush3.msra.mxu1 %v4026_v22 }
 0x29f   :  { %3079 = vmatprep.subr.mxu1 %v3771_v0 }
 0x2a0   :  { %3080 = vmatpush3.msra.mxu1 %v4068_v40 }
 0x2a1   :  { %3081 = vmatprep.subr.mxu1 %v3771_v0 }
 0x2a2   :  { %3082 = vmatpush3.msra.mxu1 %v4073_v49 }
 0x2a3   :  { %3083 = vmatprep.subr.mxu1 %v3771_v0 }
 0x2a4   :  { %3084 = vmatpush3.msra.mxu1 %v4079_v9 }
 0x2a5   :  { %2638 = vmatprep.subr.mxu1 %v365_v8 }
 0x345   :  { %v857_v24 = vpop.f32.mrf.mxu1 }
 0x346   :  { %v858_v25 = vadd.f32 %v857_v24, %v789_v23  ;;  %v349_v23 = vld [vmem:[#allocation14 + $0x78] sm:$0xff]  ;;  %v364_v24 = vld [vmem:[#allocation14 + $0xf0] sm:$0xff] }
 0x347   :  { %v3017_v26 = vpop.f32.mrf.mxu1 }
 0x348   :  { %v861_v27 = vadd.f32 %v858_v25, %v3881_v38  ;;  %v348_v25 = vld [vmem:[#allocation14 + $0x70] sm:$0xff]  ;;  %v363_v26 = vld [vmem:[#allocation14 + $0xe8] sm:$0xff] }
 0x34a   :  { %3051 = vmatmul.mubr.f32.vlgmr.msra.gmra.mxu0 %v861_v27 }
 0x34b   :  { %1116 = vmatprep.mubr.f32.mxu0 %v3771_v0  ;;  %1053 = vmatpush1.msra.mxu0 %v332_v29  ;;  %v346_v29 = vld [vmem:[#allocation14 + $0x60] sm:$0xff] }
 0x34c   :  { %1054 = vmatprep.subr.mxu0 %v331_v30  ;;  %v361_v30 = vld [vmem:[#allocation14 + $0xd8] sm:$0xff] }
 0x34d   :  { %1055 = vmatpush1.msra.mxu0 %v330_v31  ;;  %v345_v31 = vld [vmem:[#allocation14 + $0x58] sm:$0xff] }
 0x34e   :  { %1056 = vmatprep.subr.mxu0 %v329_v32  ;;  %v360_v32 = vld [vmem:[#allocation14 + $0xd0] sm:$0xff] }
 0x34f   :  { %1057 = vmatpush1.msra.mxu0 %v328_v33  ;;  %v344_v33 = vld [vmem:[#allocation14 + $0x50] sm:$0xff] }
 0x350   :  { %1058 = vmatprep.subr.mxu0 %v327_v34  ;;  %v359_v34 = vld [vmem:[#allocation14 + $0xc8] sm:$0xff] }
 0x351   :  { %1059 = vmatpush1.msra.mxu0 %v326_v35  ;;  %v343_v35 = vld [vmem:[#allocation14 + $0x48] sm:$0xff] }
 0x352   :  { %1060 = vmatprep.subr.mxu0 %v325_v36  ;;  %v358_v36 = vld [vmem:[#allocation14 + $0xc0] sm:$0xff] }
 0x353   :  { %1061 = vmatpush1.msra.mxu0 %v324_v45  ;;  %v356_v45 = vld [vmem:[#allocation14 + $0xb0] sm:$0xff] }
 0x354   :  { %1062 = vmatprep.subr.mxu0 %v323_v46  ;;  %v340_v46 = vld [vmem:[#allocation14 + $0x30] sm:$0xff] }
 0x355   :  { %1063 = vmatpush1.msra.mxu0 %v322_v47  ;;  %v355_v47 = vld [vmem:[#allocation14 + $0xa8] sm:$0xff] }
 0x356   :  { %1064 = vmatprep.subr.mxu0 %v321_v48  ;;  %v339_v48 = vld [vmem:[#allocation14 + $0x28] sm:$0xff] }
 0x357   :  { %1065 = vmatpush1.msra.mxu0 %v320_v51  ;;  %v354_v51 = vld [vmem:[#allocation14 + $0xa0] sm:$0xff] }
 0x358   :  { %1066 = vmatprep.subr.mxu0 %v319_v52  ;;  %v338_v52 = vld [vmem:[#allocation14 + $0x20] sm:$0xff] }
 0x359   :  { %1067 = vmatpush1.msra.mxu0 %v318_v53  ;;  %v3773_v53 = vmov 1966171168  }
 0x35a   :  { %1068 = vmatprep.subr.mxu0 %v317_v54  ;;  %v1007_v54 = vunpack.c.l.s4 %v3773_v53  ;;  %v1388_v53 = vld [vmem:[#allocation8 + $0x278] sm:$0xff] }
 0x35b   :  { %1069 = vmatpush1.msra.mxu0 %v316_v55 }
 0x35c   :  { %1070 = vmatprep.subr.mxu0 %v315_v56  ;;  %v1008_v55 = vunpack.c.0.s8 %v1007_v54  ;;  %v1392_v54 = vld [vmem:[#allocation8 + $0x298] sm:$0xff] }
 0x35d   :  { %1071 = vmatpush1.msra.mxu0 %v314_v57 }
 0x35e   :  { %1072 = vmatprep.subr.mxu0 %v313_v58  ;;  %v4093_v56 = vsub.s32 %v1008_v55, %v3936_v37  ;;  %v1387_v55 = vld [vmem:[#allocation8 + $0x270] sm:$0xff] }
 0x35f   :  { %1073 = vmatpush1.msra.mxu0 %v312_v59 }
 0x360   :  { %1074 = vmatprep.subr.mxu0 %v311_v60  ;;  %v1012_v60 = vrot.slane %v3957_v50, %v4093_v56 }
 0x361   :  { %1075 = vmatpush1.msra.mxu0 %v310_v61 }
 0x362   :  { %1076 = vmatprep.subr.mxu0 %v309_v63  ;;  %v1013_v61 = vcombine.high %v1012_v60, %v1012_v60  ;;  %v1024_v63 = vcombine.high %v3957_v50, %v3957_v50  ;;  %v1382_v60 = vld [vmem:[#allocation8 + $0x248] sm:$0xff] }
 0x363   :  { %1077 = vmatpush1.msra.mxu0 %v308_v1 }
 0x364   :  { %1078 = vmatprep.subr.mxu0 %v307_v2  ;;  %v1020_v1 = vrot.slane %v1013_v61, %v4093_v56  ;;  %v4101_v2 = vrot.slane %v1024_v63, %v4093_v56  ;;  %v1386_v61 = vld [vmem:[#allocation8 + $0x268] sm:$0xff]  ;;  %v1381_v63 = vld [vmem:[#allocation8 + $0x240] sm:$0xff] }
 0x365   :  { %1079 = vmatpush1.msra.mxu0 %v306_v3 }
 0x366   :  { %1080 = vmatprep.subr.mxu0 %v305_v4  ;;  %v1021_v3 = vcombine.high %v1020_v1, %v1020_v1  ;;  %v1379_v1 = vld [vmem:[#allocation8 + $0x230] sm:$0xff] }
 0x367   :  { %1081 = vmatpush1.msra.mxu0 %v304_v5 }
 0x368   :  { %1082 = vmatprep.subr.mxu0 %v303_v6  ;;  %v4106_v6 = vrot.slane %v4101_v2, %v4093_v56 }
 0x369   :  { %1083 = vmatpush1.msra.mxu0 %v302_v7 }
 0x36a   :  { %3088 = vmatprep.subr.mxu0 %v3771_v0 }
 0x40a   :  { %v928_v38 = vpop.f32.mrf.mxu0 }
 0x40b   :  { %v4087_v42 = vsub.f32 %v861_v27, %v928_v38  ;;  %v347_v27 = vld [vmem:[#allocation14 + $0x68] sm:$0xff]  ;;  %v342_v38 = vld [vmem:[#allocation14 + $0x40] sm:$0xff] }
 0x40c   :  { %v3052_v43 = vpop.f32.mrf.mxu0 }
 0x40d   :  { %v933_v44 = vmul.f32 %v4087_v42, %v4087_v42  ;;  %v357_v43 = vld [vmem:[#allocation14 + $0xb8] sm:$0xff] }
 0x40f   :  { %3086 = vmatmul.mubr.f32.vlgmr.msra.gmra.mxu1 %v933_v44  ;;  %v341_v44 = vld [vmem:[#allocation14 + $0x38] sm:$0xff] }
 0x410   :  { %2639 = vmatpush3.msra.mxu1 %v349_v23  ;;  %v337_v23 = vld [vmem:[#allocation14 + $0x18] sm:$0xff] }
 0x411   :  { %2640 = vmatprep.subr.mxu1 %v364_v24  ;;  %v352_v24 = vld [vmem:[#allocation14 + $0x90] sm:$0xff] }
 0x412   :  { %2641 = vmatpush3.msra.mxu1 %v348_v25  ;;  %v336_v25 = vld [vmem:[#allocation14 + $0x10] sm:$0xff] }
 0x413   :  { %2642 = vmatprep.subr.mxu1 %v363_v26  ;;  %v351_v26 = vld [vmem:[#allocation14 + $0x88] sm:$0xff] }
 0x414   :  { %2643 = vmatpush3.msra.mxu1 %v347_v27  ;;  %v335_v27 = vld [vmem:[#allocation14 + $0x8] sm:$0xff] }
 0x415   :  { %2644 = vmatprep.subr.mxu1 %v362_v28  ;;  %v350_v28 = vld [vmem:[#allocation14 + $0x80] sm:$0xff] }
 0x416   :  { %2645 = vmatpush3.msra.mxu1 %v346_v29  ;;  %v334_v29 = vld [vmem:[#allocation14] sm:$0xff] }
 0x417   :  { %2646 = vmatprep.subr.mxu1 %v361_v30  ;;  %v367_v30 = vld [vmem:[#allocation17] sm:$0x3] }
 0x418   :  { %2647 = vmatpush3.msra.mxu1 %v345_v31  ;;  %v1045_v31 = vrot.slane %v367_v30, %v3939_v39 }
 0x419   :  { %2648 = vmatprep.subr.mxu1 %v360_v32  ;;  %v1049_v32 = vrot.slane %v367_v30, %v3944_v41  ;;  %v1366_v30 = vld [vmem:[#allocation8 + $0x1c8] sm:$0xff] }
 0x41a   :  { %2649 = vmatpush3.msra.mxu1 %v344_v33 }
 0x41b   :  { %2650 = vmatprep.subr.mxu1 %v359_v34 }
 0x41c   :  { %2651 = vmatpush3.msra.mxu1 %v343_v35 }
 0x41d   :  { %2652 = vmatprep.subr.mxu1 %v358_v36 }
 0x41e   :  { %2653 = vmatpush3.msra.mxu1 %v342_v38 }
 0x41f   :  { %2654 = vmatprep.subr.mxu1 %v357_v43 }
 0x420   :  { %2655 = vmatpush3.msra.mxu1 %v341_v44 }
 0x421   :  { %2656 = vmatprep.subr.mxu1 %v356_v45 }
 0x422   :  { %2657 = vmatpush3.msra.mxu1 %v340_v46 }
 0x423   :  { %2658 = vmatprep.subr.mxu1 %v355_v47  ;;  %v1404_v47 = vld [vmem:[#allocation8 + $0x2f8] sm:$0xff] }
 0x424   :  { %2659 = vmatpush3.msra.mxu1 %v339_v48  ;;  %v1401_v48 = vld [vmem:[#allocation8 + $0x2e0] sm:$0xff] }
 0x425   :  { %2660 = vmatprep.subr.mxu1 %v354_v51  ;;  %v1398_v51 = vld [vmem:[#allocation8 + $0x2c8] sm:$0xff] }
 0x426   :  { %2661 = vmatpush3.msra.mxu1 %v338_v52  ;;  %v1395_v52 = vld [vmem:[#allocation8 + $0x2b0] sm:$0xff] }
 0x4cf   :  { %v1000_v57 = vpop.f32.mrf.mxu1 }
 0x4d0   :  { %v1001_v58 = vadd.f32 1e-05, %v1000_v57  ;;  %v1385_v57 = vld [vmem:[#allocation8 + $0x260] sm:$0xff] }
 0x4d1   :  { %v3087_v59 = vpop.f32.mrf.mxu1 }
 0x4d2   :  { %3470 = vrsqrt.f32 %v1001_v58  ;;  %v1389_v58 = vld [vmem:[#allocation8 + $0x280] sm:$0xff]  ;;  %v1384_v59 = vld [vmem:[#allocation8 + $0x258] sm:$0xff] }
 0x4df   :  { %v3471_v4 = vpop.eup %3470 }
 0x4e0   :  { %v1005_v5 = vmul.f32 %v3471_v4, %v4087_v42  ;;  %v353_v42 = vld [vmem:[#allocation14 + $0x98] sm:$0xff]  ;;  %v1378_v4 = vld [vmem:[#allocation8 + $0x228] sm:$0xff] }
 0x4e1   :  { %2662 = vmatprep.subr.mxu1 %v353_v42  ;;  %v1373_v42 = vld [vmem:[#allocation8 + $0x200] sm:$0xff] }
 0x4e2   :  { %v1023_v7 = vmul.f32 %v1021_v3, %v1005_v5  ;;  %2663 = vmatpush3.msra.mxu1 %v337_v23  ;;  %v1383_v3 = vld [vmem:[#allocation8 + $0x250] sm:$0xff]  ;;  %v1376_v5 = vld [vmem:[#allocation8 + $0x218] sm:$0xff]  ;;  %v1377_v23 = vld [vmem:[#allocation8 + $0x220] sm:$0xff] }
 0x4e3   :  { %2664 = vmatprep.subr.mxu1 %v352_v24  ;;  %v1372_v24 = vld [vmem:[#allocation8 + $0x1f8] sm:$0xff] }
 0x4e4   :  { %v4109_v8 = vadd.f32 %v4106_v6, %v1023_v7  ;;  %2665 = vmatpush3.msra.mxu1 %v336_v25  ;;  %v1380_v7 = vld [vmem:[#allocation8 + $0x238] sm:$0xff]  ;;  %v1370_v25 = vld [vmem:[#allocation8 + $0x1e8] sm:$0xff] }
 0x4e5   :  { %2666 = vmatprep.subr.mxu1 %v351_v26  ;;  %v1374_v26 = vld [vmem:[#allocation8 + $0x208] sm:$0xff] }
 0x4e6   :  { %1117 = vmatmul.mubr.f32.vlgmr.msra.gmra.mxu0 %v4109_v8  ;;  %2667 = vmatpush3.msra.mxu1 %v335_v27  ;;  %v1369_v27 = vld [vmem:[#allocation8 + $0x1e0] sm:$0xff] }
 0x4e7   :  { %3089 = vmatpush3.msra.mxu0 %v3980_v10  ;;  %3120 = vmatprep.mubr.msk.f32.mxu0 %vm3772_vm0, %v3771_v0 }
 0x4e8   :  { %3090 = vmatprep.subr.mxu0 %v3771_v0  ;;  %2668 = vmatprep.subr.mxu1 %v350_v28  ;;  %v1367_v28 = vld [vmem:[#allocation8 + $0x1d0] sm:$0xff] }
 0x4e9   :  { %3091 = vmatpush3.msra.mxu0 %v3982_v11  ;;  %2669 = vmatpush3.msra.mxu1 %v334_v29  ;;  %v1371_v29 = vld [vmem:[#allocation8 + $0x1f0] sm:$0xff] }
 0x4ea   :  { %3092 = vmatprep.subr.mxu0 %v3771_v0  ;;  %3123 = vmatprep.subr.mxu1 %v3771_v0 }
 0x4eb   :  { %3093 = vmatpush3.msra.mxu0 %v3986_v12 }
 0x4ec   :  { %3094 = vmatprep.subr.mxu0 %v3771_v0 }
 0x4ed   :  { %3095 = vmatpush3.msra.mxu0 %v3990_v13 }
 0x4ee   :  { %3096 = vmatprep.subr.mxu0 %v3771_v0 }
 0x4ef   :  { %3097 = vmatpush3.msra.mxu0 %v3994_v14 }
 0x4f0   :  { %3098 = vmatprep.subr.mxu0 %v3771_v0 }
 0x4f1   :  { %3099 = vmatpush3.msra.mxu0 %v3998_v15 }
 0x4f2   :  { %3100 = vmatprep.subr.mxu0 %v3771_v0 }
 0x4f3   :  { %3101 = vmatpush3.msra.mxu0 %v4002_v16 }
 0x4f4   :  { %3102 = vmatprep.subr.mxu0 %v3771_v0 }
 0x4f5   :  { %3103 = vmatpush3.msra.mxu0 %v4006_v17 }
 0x4f6   :  { %3104 = vmatprep.subr.mxu0 %v3771_v0 }
 0x4f7   :  { %3105 = vmatpush3.msra.mxu0 %v4010_v18 }
 0x4f8   :  { %3106 = vmatprep.subr.mxu0 %v3771_v0 }
 0x4f9   :  { %3107 = vmatpush3.msra.mxu0 %v4014_v19 }
 0x4fa   :  { %3108 = vmatprep.subr.mxu0 %v3771_v0 }
 0x4fb   :  { %3109 = vmatpush3.msra.mxu0 %v4018_v20 }
 0x4fc   :  { %3110 = vmatprep.subr.mxu0 %v3771_v0 }
 0x4fd   :  { %3111 = vmatpush3.msra.mxu0 %v4022_v21 }
 0x4fe   :  { %3112 = vmatprep.subr.mxu0 %v3771_v0 }
 0x4ff   :  { %3113 = vmatpush3.msra.mxu0 %v4026_v22 }
 0x500   :  { %3114 = vmatprep.subr.mxu0 %v3771_v0 }
 0x501   :  { %3115 = vmatpush3.msra.mxu0 %v4068_v40 }
 0x502   :  { %3116 = vmatprep.subr.mxu0 %v3771_v0 }
 0x503   :  { %3117 = vmatpush3.msra.mxu0 %v4073_v49 }
 0x504   :  { %3118 = vmatprep.subr.mxu0 %v3771_v0 }
 0x505   :  { %3119 = vmatpush3.msra.mxu0 %v4079_v9 }
 0x5a6   :  { %v1118_v33 = vpop.f32.mrf.mxu0 }
 0x5a7   :  { %v1119_v34 = vadd.f32 %v1118_v33, %v1045_v31  ;;  %v1364_v31 = vld [vmem:[#allocation8 + $0x1b8] sm:$0xff]  ;;  %v1363_v33 = vld [vmem:[#allocation8 + $0x1b0] sm:$0xff] }
 0x5a8   :  { %v1120_v35 = vpop.f32.mrf.mxu0 }
 0x5a9   :  { %v1121_v36 = vadd.f32 %v1120_v35, %v1049_v32  ;;  %v1123_v43 = vmax.f32 %v1119_v34, 0.0  ;;  %v1368_v32 = vld [vmem:[#allocation8 + $0x1d8] sm:$0xff]  ;;  %v1361_v34 = vld [vmem:[#allocation8 + $0x1a0] sm:$0xff] }
 0x5aa   :  { %v1365_v35 = vld [vmem:[#allocation8 + $0x1c0] sm:$0xff] }
 0x5ab   :  { %v1124_v38 = vmax.f32 %v1121_v36, 0.0  ;;  %v1360_v36 = vld [vmem:[#allocation8 + $0x198] sm:$0xff] }
 0x5ad   :  { %1191 = vmatprep.mubr.f32.mxu1 %v1124_v38  ;;  %v1358_v38 = vld [vmem:[#allocation8 + $0x188] sm:$0xff] }
 0x5ae   :  { %1192 = vmatmul.mubr.f32.vlgmr.msra.gmra.mxu1 %v1123_v43  ;;  %v1362_v43 = vld [vmem:[#allocation8 + $0x1a8] sm:$0xff] }
 0x5af   :  { %3124 = vmatpush3.msra.mxu1 %v3980_v10  ;;  %3155 = vmatprep.mubr.msk.f32.mxu1 %vm3772_vm0, %v3771_v0 }
 0x5b0   :  { %3125 = vmatprep.subr.mxu1 %v3771_v0 }
 0x5b1   :  { %3126 = vmatpush3.msra.mxu1 %v3982_v11  ;;  %v1125_v11 = vrot.slane %v3957_v50, 5  ;;  %v1393_v50 = vld [vmem:[#allocation8 + $0x2a0] sm:$0xff] }
 0x5b2   :  { %3127 = vmatprep.subr.mxu1 %v3771_v0 }
 0x5b3   :  { %3128 = vmatpush3.msra.mxu1 %v3986_v12 }
 0x5b4   :  { %3129 = vmatprep.subr.mxu1 %v3771_v0 }
 0x5b5   :  { %3130 = vmatpush3.msra.mxu1 %v3990_v13 }
 0x5b6   :  { %3131 = vmatprep.subr.mxu1 %v3771_v0 }
 0x5b7   :  { %3132 = vmatpush3.msra.mxu1 %v3994_v14 }
 0x5b8   :  { %3133 = vmatprep.subr.mxu1 %v3771_v0 }
 0x5b9   :  { %3134 = vmatpush3.msra.mxu1 %v3998_v15 }
 0x5ba   :  { %3135 = vmatprep.subr.mxu1 %v3771_v0 }
 0x5bb   :  { %3136 = vmatpush3.msra.mxu1 %v4002_v16  ;;  %v1403_v16 = vld [vmem:[#allocation8 + $0x2f0] sm:$0xff] }
 0x5bc   :  { %3137 = vmatprep.subr.mxu1 %v3771_v0  ;;  %1543 = vmatprep.subr.mxu0 %v1403_v16  ;;  %v1345_v16 = vcombine.high %v4101_v2, %v4101_v2  ;;  %v1433_v2 = vld [vmem:[#allocation10 + $0x1d8] sm:$0xff] }
 0x5bd   :  { %3138 = vmatpush3.msra.mxu1 %v4006_v17  ;;  %v1402_v17 = vld [vmem:[#allocation8 + $0x2e8] sm:$0xff] }
 0x5be   :  { %3139 = vmatprep.subr.mxu1 %v3771_v0 }
 0x5bf   :  { %3140 = vmatpush3.msra.mxu1 %v4010_v18  ;;  %v1400_v18 = vld [vmem:[#allocation8 + $0x2d8] sm:$0xff] }
 0x5c0   :  { %3141 = vmatprep.subr.mxu1 %v3771_v0 }
 0x5c1   :  { %3142 = vmatpush3.msra.mxu1 %v4014_v19  ;;  %v1399_v19 = vld [vmem:[#allocation8 + $0x2d0] sm:$0xff] }
 0x5c2   :  { %3143 = vmatprep.subr.mxu1 %v3771_v0 }
 0x5c3   :  { %3144 = vmatpush3.msra.mxu1 %v4018_v20  ;;  %v1397_v20 = vld [vmem:[#allocation8 + $0x2c0] sm:$0xff] }
 0x5c4   :  { %3145 = vmatprep.subr.mxu1 %v3771_v0 }
 0x5c5   :  { %3146 = vmatpush3.msra.mxu1 %v4022_v21  ;;  %v1396_v21 = vld [vmem:[#allocation8 + $0x2b8] sm:$0xff] }
 0x5c6   :  { %3147 = vmatprep.subr.mxu1 %v3771_v0 }
 0x5c7   :  { %3148 = vmatpush3.msra.mxu1 %v4026_v22  ;;  %v1394_v22 = vld [vmem:[#allocation8 + $0x2a8] sm:$0xff] }
 0x5c8   :  { %3149 = vmatprep.subr.mxu1 %v3771_v0 }
 0x5c9   :  { %3150 = vmatpush3.msra.mxu1 %v4068_v40  ;;  %v1391_v40 = vld [vmem:[#allocation8 + $0x290] sm:$0xff] }
 0x5ca   :  { %3151 = vmatprep.subr.mxu1 %v3771_v0 }
 0x5cb   :  { %3152 = vmatpush3.msra.mxu1 %v4073_v49  ;;  %v1390_v49 = vld [vmem:[#allocation8 + $0x288] sm:$0xff] }
 0x5cc   :  { %3153 = vmatprep.subr.mxu1 %v3771_v0 }
 0x5cd   :  { %3154 = vmatpush3.msra.mxu1 %v4079_v9 }
 0x5ce   :  { %3158 = vmatprep.subr.mxu1 %v3771_v0 }
 0x66e   :  { %v2670_v10 = vpop.f32.mrf.mxu1 }
 0x670   :  { %v2671_v12 = vpop.f32.mrf.mxu1 }
 0x671   :  { %v2672_v13 = vadd.f32 %v2671_v12, %v2670_v10  ;;  %v1357_v10 = vld [vmem:[#allocation8 + $0x180] sm:$0xff]  ;;  %v1437_v12 = vld [vmem:[#allocation10 + $0x1f8] sm:$0xff] }
 0x673   :  { %v1194_v14 = vadd.f32 %v2672_v13, %v1125_v11  ;;  %v1359_v11 = vld [vmem:[#allocation8 + $0x190] sm:$0xff] }
 0x675   :  { %v1197_v15 = vadd.f32 %v1194_v14, %v4109_v8  ;;  %v1375_v8 = vld [vmem:[#allocation8 + $0x210] sm:$0xff] }
 0x677   :  { %3121 = vmatmul.mubr.f32.vlgmr.msra.gmra.mxu0 %v1197_v15 }
 0x678   :  { %1607 = vmatprep.mubr.f32.mxu0 %v3771_v0  ;;  %1544 = vmatpush1.msra.mxu0 %v1402_v17  ;;  %v1352_v17 = vrot.slane %v1345_v16, %v4093_v56 }
 0x679   :  { %1545 = vmatprep.subr.mxu0 %v1400_v18  ;;  %v1342_v18 = vcombine.high %v4106_v6, %v4106_v6  ;;  %v1432_v6 = vld [vmem:[#allocation10 + $0x1d0] sm:$0xff] }
 0x67a   :  { %1546 = vmatpush1.msra.mxu0 %v1399_v19 }
 0x67b   :  { %1547 = vmatprep.subr.mxu0 %v1397_v20 }
 0x67c   :  { %1548 = vmatpush1.msra.mxu0 %v1396_v21  ;;  %v1353_v21 = vcombine.high %v1352_v17, %v1352_v17 }
 0x67d   :  { %1549 = vmatprep.subr.mxu0 %v1394_v22 }
 0x67e   :  { %1550 = vmatpush1.msra.mxu0 %v1393_v50 }
 0x67f   :  { %1551 = vmatprep.subr.mxu0 %v1391_v40  ;;  %v1436_v40 = vld [vmem:[#allocation10 + $0x1f0] sm:$0xff] }
 0x680   :  { %1552 = vmatpush1.msra.mxu0 %v1390_v49  ;;  %v1435_v49 = vld [vmem:[#allocation10 + $0x1e8] sm:$0xff] }
 0x681   :  { %1553 = vmatprep.subr.mxu0 %v1388_v53  ;;  %v1427_v53 = vld [vmem:[#allocation10 + $0x1a8] sm:$0xff] }
 0x682   :  { %1554 = vmatpush1.msra.mxu0 %v1387_v55  ;;  %v4230_v55 = vld [vmem:[#allocation7 + $0x60] sm:$0xff] }
 0x683   :  { %1555 = vmatprep.subr.mxu0 %v1385_v57  ;;  %v1425_v57 = vld [vmem:[#allocation10 + $0x198] sm:$0xff] }
 0x684   :  { %1556 = vmatpush1.msra.mxu0 %v1384_v59  ;;  %v4234_v59 = vld [vmem:[#allocation7 + $0x58] sm:$0xff] }
 0x685   :  { %1557 = vmatprep.subr.mxu0 %v1382_v60  ;;  %v1423_v60 = vld [vmem:[#allocation10 + $0x188] sm:$0xff] }
 0x686   :  { %1558 = vmatpush1.msra.mxu0 %v1381_v63  ;;  %v4238_v63 = vld [vmem:[#allocation7 + $0x50] sm:$0xff] }
 0x687   :  { %1559 = vmatprep.subr.mxu0 %v1379_v1  ;;  %v1421_v1 = vld [vmem:[#allocation10 + $0x178] sm:$0xff] }
 0x688   :  { %1560 = vmatpush1.msra.mxu0 %v1378_v4  ;;  %v4242_v4 = vld [vmem:[#allocation7 + $0x48] sm:$0xff] }
 0x689   :  { %1561 = vmatprep.subr.mxu0 %v1376_v5  ;;  %v1419_v5 = vld [vmem:[#allocation10 + $0x168] sm:$0xff] }
 0x68a   :  { %1562 = vmatpush1.msra.mxu0 %v1375_v8  ;;  %v4246_v8 = vld [vmem:[#allocation7 + $0x40] sm:$0xff] }
 0x68b   :  { %1563 = vmatprep.subr.mxu0 %v1373_v42  ;;  %v1417_v42 = vld [vmem:[#allocation10 + $0x158] sm:$0xff] }
 0x68c   :  { %1564 = vmatpush1.msra.mxu0 %v1372_v24  ;;  %v4250_v24 = vld [vmem:[#allocation7 + $0x38] sm:$0xff] }
 0x68d   :  { %1565 = vmatprep.subr.mxu0 %v1370_v25  ;;  %v1415_v25 = vld [vmem:[#allocation10 + $0x148] sm:$0xff] }
 0x68e   :  { %1566 = vmatpush1.msra.mxu0 %v1369_v27  ;;  %v3493_v27 = vld [vmem:[#allocation7 + $0x30] sm:$0xff] }
 0x68f   :  { %1567 = vmatprep.subr.mxu0 %v1367_v28  ;;  %v1413_v28 = vld [vmem:[#allocation10 + $0x138] sm:$0xff] }
 0x690   :  { %1568 = vmatpush1.msra.mxu0 %v1366_v30  ;;  %v3494_v30 = vld [vmem:[#allocation7 + $0x28] sm:$0xff] }
 0x691   :  { %1569 = vmatprep.subr.mxu0 %v1364_v31  ;;  %v1411_v31 = vld [vmem:[#allocation10 + $0x128] sm:$0xff] }
 0x692   :  { %1570 = vmatpush1.msra.mxu0 %v1363_v33  ;;  %v3495_v33 = vld [vmem:[#allocation7 + $0x20] sm:$0xff] }
 0x693   :  { %1571 = vmatprep.subr.mxu0 %v1361_v34  ;;  %v1409_v34 = vld [vmem:[#allocation10 + $0x118] sm:$0xff] }
 0x694   :  { %1572 = vmatpush1.msra.mxu0 %v1360_v36  ;;  %v3496_v36 = vld [vmem:[#allocation7 + $0x18] sm:$0xff] }
 0x695   :  { %1573 = vmatprep.subr.mxu0 %v1358_v38  ;;  %v1407_v38 = vld [vmem:[#allocation10 + $0x108] sm:$0xff] }
 0x696   :  { %1574 = vmatpush1.msra.mxu0 %v1357_v10  ;;  %v3497_v10 = vld [vmem:[#allocation7 + $0x10] sm:$0xff] }
 0x697   :  { %1684 = vmatprep.subr.mxu0 %v1437_v12  ;;  %v3499_v12 = vld [vmem:[#allocation5] sm:$0xff] }
 0x737   :  { %v1264_v9 = vpop.f32.mrf.mxu0 }
 0x738   :  { %v4185_v44 = vsub.f32 %v1197_v15, %v1264_v9  ;;  %v1434_v9 = vld [vmem:[#allocation10 + $0x1e0] sm:$0xff] }
 0x739   :  { %v3122_v45 = vpop.f32.mrf.mxu0 }
 0x73a   :  { %v1269_v46 = vmul.f32 %v4185_v44, %v4185_v44  ;;  %v4218_v45 = vld [vmem:[#allocation7 + $0x78] sm:$0xff] }
 0x73c   :  { %3156 = vmatmul.mubr.f32.vlgmr.msra.gmra.mxu1 %v1269_v46  ;;  %v1430_v46 = vld [vmem:[#allocation10 + $0x1c0] sm:$0xff] }
 0x73d   :  { %3159 = vmatpush3.msra.mxu1 %v1404_v47  ;;  %3190 = vmatprep.mubr.msk.f32.mxu1 %vm3772_vm0, %v3771_v0  ;;  %v4222_v47 = vld [vmem:[#allocation7 + $0x70] sm:$0xff] }
 0x73e   :  { %3160 = vmatprep.subr.mxu1 %v3771_v0 }
 0x73f   :  { %3161 = vmatpush3.msra.mxu1 %v1401_v48  ;;  %v1429_v48 = vld [vmem:[#allocation10 + $0x1b8] sm:$0xff] }
 0x740   :  { %3162 = vmatprep.subr.mxu1 %v3771_v0 }
 0x741   :  { %3163 = vmatpush3.msra.mxu1 %v1398_v51  ;;  %v1428_v51 = vld [vmem:[#allocation10 + $0x1b0] sm:$0xff] }
 0x742   :  { %3164 = vmatprep.subr.mxu1 %v3771_v0 }
 0x743   :  { %3165 = vmatpush3.msra.mxu1 %v1395_v52  ;;  %v4226_v52 = vld [vmem:[#allocation7 + $0x68] sm:$0xff] }
 0x744   :  { %3166 = vmatprep.subr.mxu1 %v3771_v0 }
 0x745   :  { %3167 = vmatpush3.msra.mxu1 %v1392_v54  ;;  %v1426_v54 = vld [vmem:[#allocation10 + $0x1a0] sm:$0xff] }
 0x746   :  { %3168 = vmatprep.subr.mxu1 %v3771_v0 }
 0x747   :  { %3169 = vmatpush3.msra.mxu1 %v1389_v58  ;;  %v1424_v58 = vld [vmem:[#allocation10 + $0x190] sm:$0xff] }
 0x748   :  { %3170 = vmatprep.subr.mxu1 %v3771_v0 }
 0x749   :  { %3171 = vmatpush3.msra.mxu1 %v1386_v61  ;;  %v1422_v61 = vld [vmem:[#allocation10 + $0x180] sm:$0xff] }
 0x74a   :  { %3172 = vmatprep.subr.mxu1 %v3771_v0 }
 0x74b   :  { %3173 = vmatpush3.msra.mxu1 %v1383_v3  ;;  %v1420_v3 = vld [vmem:[#allocation10 + $0x170] sm:$0xff] }
 0x74c   :  { %3174 = vmatprep.subr.mxu1 %v3771_v0 }
 0x74d   :  { %3175 = vmatpush3.msra.mxu1 %v1380_v7  ;;  %v1418_v7 = vld [vmem:[#allocation10 + $0x160] sm:$0xff] }
 0x74e   :  { %3176 = vmatprep.subr.mxu1 %v3771_v0 }
 0x74f   :  { %3177 = vmatpush3.msra.mxu1 %v1377_v23  ;;  %v1416_v23 = vld [vmem:[#allocation10 + $0x150] sm:$0xff] }
 0x750   :  { %3178 = vmatprep.subr.mxu1 %v3771_v0 }
 0x751   :  { %3179 = vmatpush3.msra.mxu1 %v1374_v26  ;;  %v1414_v26 = vld [vmem:[#allocation10 + $0x140] sm:$0xff] }
 0x752   :  { %3180 = vmatprep.subr.mxu1 %v3771_v0 }
 0x753   :  { %3181 = vmatpush3.msra.mxu1 %v1371_v29  ;;  %v1412_v29 = vld [vmem:[#allocation10 + $0x130] sm:$0xff] }
 0x754   :  { %3182 = vmatprep.subr.mxu1 %v3771_v0 }
 0x755   :  { %3183 = vmatpush3.msra.mxu1 %v1368_v32  ;;  %v1410_v32 = vld [vmem:[#allocation10 + $0x120] sm:$0xff] }
 0x756   :  { %3184 = vmatprep.subr.mxu1 %v3771_v0 }
 0x757   :  { %3185 = vmatpush3.msra.mxu1 %v1365_v35  ;;  %v1408_v35 = vld [vmem:[#allocation10 + $0x110] sm:$0xff] }
 0x758   :  { %3186 = vmatprep.subr.mxu1 %v3771_v0 }
 0x759   :  { %3187 = vmatpush3.msra.mxu1 %v1362_v43  ;;  %v1406_v43 = vld [vmem:[#allocation10 + $0x100] sm:$0xff] }
 0x75a   :  { %3188 = vmatprep.subr.mxu1 %v3771_v0 }
 0x75b   :  { %3189 = vmatpush3.msra.mxu1 %v1359_v11  ;;  %v3498_v11 = vld [vmem:[#allocation7 + $0x8] sm:$0xff] }
 0x75c   :  { %3193 = vmatprep.subr.mxu1 %v3771_v0 }
 0x7fc   :  { %v1336_v13 = vpop.f32.mrf.mxu1 }
 0x7fd   :  { %v1337_v14 = vadd.f32 1e-05, %v1336_v13  ;;  %v3500_v13 = vld [vmem:[#allocation7] sm:$0xff] }
 0x7fe   :  { %v3157_v15 = vpop.f32.mrf.mxu1 }
 0x7ff   :  { %3472 = vrsqrt.f32 %v1337_v14  ;;  %v4291_v14 = vld [vmem:[#allocation16 + $0x3] sm:$0x7] }
 0x800   :  { %v1531_v15 = vrot.slane %v4291_v14, %v3939_v39  ;;  %v1535_v16 = vrot.slane %v4291_v14, %v3944_v41 }
 0x80c   :  { %v3473_v19 = vpop.eup %3472 }
 0x80d   :  { %v1341_v20 = vmul.f32 %v3473_v19, %v4185_v44  ;;  %v1431_v44 = vld [vmem:[#allocation10 + $0x1c8] sm:$0xff] }
 0x80f   :  { %v1344_v22 = vmul.f32 %v1342_v18, %v1341_v20 }
 0x811   :  { %v4213_v50 = vadd.f32 %v1353_v21, %v1344_v22 }
 0x813   :  { %1608 = vmatmul.mubr.f32.vlgmr.msra.gmra.mxu0 %v4213_v50  ;;  %3191 = vmatmul.mubr.f32.vlgmr.msra.gmra.mxu1 %v4213_v50 }
 0x814   :  { %1685 = vmatpush1.msra.mxu0 %v1436_v40  ;;  %1748 = vmatprep.mubr.f32.mxu0 %v3771_v0 }
 0x815   :  { %1686 = vmatprep.subr.mxu0 %v1435_v49  ;;  %3194 = vmatpush3.msra.mxu1 %v4218_v45  ;;  %v4304_v49 = vld [vmem:[%s4544_s10 + $0x8] sm:$0xff]  ;;  %s3774_s10 = smov [#allocation19]  }
 0x816   :  { %1687 = vmatpush1.msra.mxu0 %v1434_v9  ;;  %3195 = vmatprep.subr.mxu1 %v3771_v0  ;;  %v1758_v9 = vrot.slane %v4304_v49, %v3939_v39  ;;  %v1947_v37 = vrot.slane %v4304_v49, 2  ;;  %s2521_s30 = sshll.u32 %s3774_s10, 4  ;;  %s2522_s30 = int_to_ptr.vmem [resolvable:$true] %s2521_s30 }
 0x817   :  { %1688 = vmatprep.subr.mxu0 %v1433_v2  ;;  %3196 = vmatpush3.msra.mxu1 %v4222_v47  ;;  %s3717_s12 = scalar_lea.vmem %s2522_s30, 16  ;;  %s3721_s0 = scalar_lea.vmem %s2522_s30, 32 }
 0x818   :  { %1689 = vmatpush1.msra.mxu0 %v1432_v6  ;;  %3197 = vmatprep.subr.mxu1 %v3771_v0  ;;  %p3718_p8 = scmp.ne.s32.totalorder %s2522_s30, %s3717_s12  ;;  %p3722_p9 = scmp.lt.s32.totalorder %s2522_s30, %s2522_s30 }
 0x819   :  { %1690 = vmatprep.subr.mxu0 %v1431_v44  ;;  %3198 = vmatpush3.msra.mxu1 %v4226_v52  ;;  %p3723_p10 = scmp.lt.s32.totalorder %s3721_s0, %s3717_s12 }
 0x81a   :  { %1691 = vmatpush1.msra.mxu0 %v1430_v46  ;;  %3199 = vmatprep.subr.mxu1 %v3771_v0  ;;  %v4309_v46 = vld [vmem:[#allocation7 + $0xf8] sm:$0xff] }
 0x81b   :  { %1692 = vmatprep.subr.mxu0 %v1429_v48  ;;  %3200 = vmatpush3.msra.mxu1 %v4230_v55  ;;  %v4319_v48 = vld [vmem:[#allocation7 + $0xe8] sm:$0xff]  ;;  %p3724_p11 = por %p3723_p10, %p3722_p9 }
 0x81c   :  { %1693 = vmatpush1.msra.mxu0 %v1428_v51  ;;  %3201 = vmatprep.subr.mxu1 %v3771_v0  ;;  %v4323_v51 = vld [vmem:[#allocation7 + $0xe0] sm:$0xff] }
 0x81d   :  { %1694 = vmatprep.subr.mxu0 %v1427_v53  ;;  %3202 = vmatpush3.msra.mxu1 %v4234_v59  ;;  %v4331_v53 = vld [vmem:[#allocation7 + $0xd0] sm:$0xff]  ;;  %p3725_p12 = pnand %p3724_p11, %p3718_p8 }
 0x81e   :  { %1695 = vmatpush1.msra.mxu0 %v1426_v54  ;;  %3203 = vmatprep.subr.mxu1 %v3771_v0  ;;  %v4335_v54 = vld [vmem:[#allocation7 + $0xc8] sm:$0xff] }
 0x81f   :  { %1696 = vmatprep.subr.mxu0 %v1425_v57  ;;  %3204 = vmatpush3.msra.mxu1 %v4238_v63  ;;  %v4343_v57 = vld [vmem:[#allocation7 + $0xb8] sm:$0xff] }
 0x820   :  { %1697 = vmatpush1.msra.mxu0 %v1424_v58  ;;  %3205 = vmatprep.subr.mxu1 %v3771_v0  ;;  %v4347_v58 = vld [vmem:[#allocation7 + $0xb0] sm:$0xff] }
 0x821   :  { %1698 = vmatprep.subr.mxu0 %v1423_v60  ;;  %3206 = vmatpush3.msra.mxu1 %v4242_v4  ;;  %v4355_v60 = vld [vmem:[#allocation7 + $0xa0] sm:$0xff] }
 0x822   :  { %1699 = vmatpush1.msra.mxu0 %v1422_v61  ;;  %3207 = vmatprep.subr.mxu1 %v3771_v0  ;;  %v4359_v61 = vld [vmem:[#allocation7 + $0x98] sm:$0xff] }
 0x823   :  { %1700 = vmatprep.subr.mxu0 %v1421_v1  ;;  %3208 = vmatpush3.msra.mxu1 %v4246_v8  ;;  %v4367_v1 = vld [vmem:[#allocation7 + $0x88] sm:$0xff] }
 0x824   :  { %1701 = vmatpush1.msra.mxu0 %v1420_v3  ;;  %3209 = vmatprep.subr.mxu1 %v3771_v0  ;;  %v4371_v3 = vld [vmem:[#allocation7 + $0x80] sm:$0xff] }
 0x825   :  { %1702 = vmatprep.subr.mxu0 %v1419_v5  ;;  %3210 = vmatpush3.msra.mxu1 %v4250_v24  ;;  %v1453_v5 = vld [vmem:[#allocation11 + $0xf0] sm:$0xff] }
 0x826   :  { %1703 = vmatpush1.msra.mxu0 %v1418_v7  ;;  %3211 = vmatprep.subr.mxu1 %v3771_v0  ;;  %v1452_v7 = vld [vmem:[#allocation11 + $0xe8] sm:$0xff] }
 0x827   :  { %1704 = vmatprep.subr.mxu0 %v1417_v42  ;;  %3212 = vmatpush3.msra.mxu1 %v3493_v27  ;;  %v1450_v42 = vld [vmem:[#allocation11 + $0xd8] sm:$0xff] }
 0x828   :  { %1705 = vmatpush1.msra.mxu0 %v1416_v23  ;;  %3213 = vmatprep.subr.mxu1 %v3771_v0  ;;  %v1449_v23 = vld [vmem:[#allocation11 + $0xd0] sm:$0xff] }
 0x829   :  { %1706 = vmatprep.subr.mxu0 %v1415_v25  ;;  %3214 = vmatpush3.msra.mxu1 %v3494_v30  ;;  %v1447_v25 = vld [vmem:[#allocation11 + $0xc0] sm:$0xff] }
 0x82a   :  { %1707 = vmatpush1.msra.mxu0 %v1414_v26  ;;  %3215 = vmatprep.subr.mxu1 %v3771_v0  ;;  %v1446_v26 = vld [vmem:[#allocation11 + $0xb8] sm:$0xff] }
 0x82b   :  { %1708 = vmatprep.subr.mxu0 %v1413_v28  ;;  %3216 = vmatpush3.msra.mxu1 %v3495_v33  ;;  %v1444_v28 = vld [vmem:[#allocation11 + $0xa8] sm:$0xff] }
 0x82c   :  { %1709 = vmatpush1.msra.mxu0 %v1412_v29  ;;  %3217 = vmatprep.subr.mxu1 %v3771_v0  ;;  %v1443_v29 = vld [vmem:[#allocation11 + $0xa0] sm:$0xff] }
 0x82d   :  { %1710 = vmatprep.subr.mxu0 %v1411_v31  ;;  %3218 = vmatpush3.msra.mxu1 %v3496_v36  ;;  %v1441_v31 = vld [vmem:[#allocation11 + $0x90] sm:$0xff] }
 0x82e   :  { %1711 = vmatpush1.msra.mxu0 %v1410_v32  ;;  %3219 = vmatprep.subr.mxu1 %v3771_v0  ;;  %v1440_v32 = vld [vmem:[#allocation11 + $0x88] sm:$0xff] }
 0x82f   :  { %1712 = vmatprep.subr.mxu0 %v1409_v34  ;;  %3220 = vmatpush3.msra.mxu1 %v3497_v10 }
 0x830   :  { %1713 = vmatpush1.msra.mxu0 %v1408_v35  ;;  %3221 = vmatprep.subr.mxu1 %v3771_v0 }
 0x831   :  { %1714 = vmatprep.subr.mxu0 %v1407_v38  ;;  %3222 = vmatpush3.msra.mxu1 %v3498_v11 }
 0x832   :  { %1715 = vmatpush1.msra.mxu0 %v1406_v43  ;;  %3223 = vmatprep.subr.mxu1 %v3771_v0 }
 0x833   :  { %1749 = vmatmul.mubr.f32.vlgmr.msra.gmra.mxu0 %v3499_v12  ;;  %3228 = vmatprep.subr.mxu0 %v3771_v0 }
 0x834   :  { %3229 = vmatpush3.msra.mxu0 %v4218_v45  ;;  %3224 = vmatpush3.msra.mxu1 %v3500_v13 }
 0x835   :  { %3225 = vmatprep.mubr.msk.f32.mxu1 %vm3772_vm0, %v3771_v0  ;;  %3230 = vmatprep.subr.mxu0 %v3771_v0 }
 0x836   :  { %3231 = vmatpush3.msra.mxu0 %v4222_v47  ;;  %3260 = vmatprep.mubr.msk.f32.mxu0 %vm3772_vm0, %v3771_v0  ;;  %v4315_v47 = vld [vmem:[#allocation7 + $0xf0] sm:$0xff] }
 0x837   :  { %3232 = vmatprep.subr.mxu0 %v3771_v0  ;;  %3263 = vmatprep.subr.mxu1 %v3771_v0 }
 0x838   :  { %3233 = vmatpush3.msra.mxu0 %v4226_v52  ;;  %v4327_v52 = vld [vmem:[#allocation7 + $0xd8] sm:$0xff] }
 0x839   :  { %3234 = vmatprep.subr.mxu0 %v3771_v0 }
 0x83a   :  { %3235 = vmatpush3.msra.mxu0 %v4230_v55  ;;  %v4339_v55 = vld [vmem:[#allocation7 + $0xc0] sm:$0xff] }
 0x83b   :  { %3236 = vmatprep.subr.mxu0 %v3771_v0 }
 0x83c   :  { %3237 = vmatpush3.msra.mxu0 %v4234_v59  ;;  %v4351_v59 = vld [vmem:[#allocation7 + $0xa8] sm:$0xff] }
 0x83d   :  { %3238 = vmatprep.subr.mxu0 %v3771_v0 }
 0x83e   :  { %3239 = vmatpush3.msra.mxu0 %v4238_v63  ;;  %v4363_v63 = vld [vmem:[#allocation7 + $0x90] sm:$0xff] }
 0x83f   :  { %3240 = vmatprep.subr.mxu0 %v3771_v0 }
 0x840   :  { %3241 = vmatpush3.msra.mxu0 %v4242_v4  ;;  %v1454_v4 = vld [vmem:[#allocation11 + $0xf8] sm:$0xff] }
 0x841   :  { %3242 = vmatprep.subr.mxu0 %v3771_v0 }
 0x842   :  { %3243 = vmatpush3.msra.mxu0 %v4246_v8  ;;  %v1451_v8 = vld [vmem:[#allocation11 + $0xe0] sm:$0xff] }
 0x843   :  { %3244 = vmatprep.subr.mxu0 %v3771_v0 }
 0x844   :  { %3245 = vmatpush3.msra.mxu0 %v4250_v24  ;;  %v1448_v24 = vld [vmem:[#allocation11 + $0xc8] sm:$0xff] }
 0x845   :  { %3246 = vmatprep.subr.mxu0 %v3771_v0 }
 0x846   :  { %3247 = vmatpush3.msra.mxu0 %v3493_v27  ;;  %v1445_v27 = vld [vmem:[#allocation11 + $0xb0] sm:$0xff] }
 0x847   :  { %3248 = vmatprep.subr.mxu0 %v3771_v0 }
 0x848   :  { %3249 = vmatpush3.msra.mxu0 %v3494_v30  ;;  %v1442_v30 = vld [vmem:[#allocation11 + $0x98] sm:$0xff] }
 0x849   :  { %3250 = vmatprep.subr.mxu0 %v3771_v0 }
 0x84a   :  { %3251 = vmatpush3.msra.mxu0 %v3495_v33  ;;  %v1439_v33 = vld [vmem:[#allocation11 + $0x80] sm:$0xff] }
 0x84b   :  { %3252 = vmatprep.subr.mxu0 %v3771_v0 }
 0x84c   :  { %3253 = vmatpush3.msra.mxu0 %v3496_v36 }
 0x84d   :  { %3254 = vmatprep.subr.mxu0 %v3771_v0 }
 0x84e   :  { %3255 = vmatpush3.msra.mxu0 %v3497_v10 }
 0x84f   :  { %3256 = vmatprep.subr.mxu0 %v3771_v0 }
 0x850   :  { %3257 = vmatpush3.msra.mxu0 %v3498_v11 }
 0x851   :  { %3258 = vmatprep.subr.mxu0 %v3771_v0 }
 0x852   :  { %3259 = vmatpush3.msra.mxu0 %v3500_v13 }
 0x853   :  { %3298 = vmatprep.subr.mxu0 %v3771_v0 }
 0x8d3   :  { %v1609_v17 = vpop.f32.mrf.mxu0  ;;  %v4297_v18 = vpop.f32.mrf.mxu1 }
 0x8d4   :  { %v1610_v21 = vadd.f32 %v1609_v17, %v1531_v15 }
 0x8d5   :  { %v1611_v19 = vpop.f32.mrf.mxu0  ;;  %v3192_v20 = vpop.f32.mrf.mxu1 }
 0x8d6   :  { %v1612_v22 = vadd.f32 %v1611_v19, %v1535_v16  ;;  %v1839_v6 = vrot.slane %v1610_v21, %v3939_v39 }
 0x8d8   :  { %v1765_v40 = vmul.f32 %v1612_v22, %v1610_v21 }
 0x8da   :  { %3226 = vmatmul.mubr.f32.vlgmr.msra.gmra.mxu1 %v1765_v40  ;;  %v1763_v40 = vrot.slane %v4304_v49, %v3944_v41 }
 0x8db   :  { %3295 = vmatprep.mubr.msk.f32.mxu1 %vm3772_vm0, %v3771_v0  ;;  %3264 = vmatpush3.msra.mxu1 %v1454_v4 }
 0x8dc   :  { %3265 = vmatprep.subr.mxu1 %v3771_v0 }
 0x8dd   :  { %3266 = vmatpush3.msra.mxu1 %v1453_v5 }
 0x8de   :  { %3267 = vmatprep.subr.mxu1 %v3771_v0 }
 0x8df   :  { %3268 = vmatpush3.msra.mxu1 %v1452_v7 }
 0x8e0   :  { %3269 = vmatprep.subr.mxu1 %v3771_v0 }
 0x8e1   :  { %3270 = vmatpush3.msra.mxu1 %v1451_v8 }
 0x8e2   :  { %3271 = vmatprep.subr.mxu1 %v3771_v0 }
 0x8e3   :  { %3272 = vmatpush3.msra.mxu1 %v1450_v42 }
 0x8e4   :  { %3273 = vmatprep.subr.mxu1 %v3771_v0 }
 0x8e5   :  { %3274 = vmatpush3.msra.mxu1 %v1449_v23 }
 0x8e6   :  { %3275 = vmatprep.subr.mxu1 %v3771_v0 }
 0x8e7   :  { %3276 = vmatpush3.msra.mxu1 %v1448_v24 }
 0x8e8   :  { %3277 = vmatprep.subr.mxu1 %v3771_v0 }
 0x8e9   :  { %3278 = vmatpush3.msra.mxu1 %v1447_v25 }
 0x8ea   :  { %3279 = vmatprep.subr.mxu1 %v3771_v0 }
 0x8eb   :  { %3280 = vmatpush3.msra.mxu1 %v1446_v26 }
 0x8ec   :  { %3281 = vmatprep.subr.mxu1 %v3771_v0 }
 0x8ed   :  { %3282 = vmatpush3.msra.mxu1 %v1445_v27 }
 0x8ee   :  { %3283 = vmatprep.subr.mxu1 %v3771_v0 }
 0x8ef   :  { %3284 = vmatpush3.msra.mxu1 %v1444_v28 }
 0x8f0   :  { %3285 = vmatprep.subr.mxu1 %v3771_v0 }
 0x8f1   :  { %3286 = vmatpush3.msra.mxu1 %v1443_v29  ;;  %v1539_v29 = vrot.slane %v4291_v14, %v380_v62 }
 0x8f2   :  { %3287 = vmatprep.subr.mxu1 %v3771_v0 }
 0x8f3   :  { %v1750_v2 = vpop.f32.mrf.mxu0  ;;  %3288 = vmatpush3.msra.mxu1 %v1442_v30 }
 0x8f4   :  { %v1759_v45 = vadd.f32 %v1758_v9, %v1750_v2  ;;  %3289 = vmatprep.subr.mxu1 %v3771_v0 }
 0x8f5   :  { %3290 = vmatpush3.msra.mxu1 %v1441_v31  ;;  %v1752_v36 = vpop.f32.mrf.mxu0  ;;  %v1681_v31 = vadd.f32 %v4297_v18, %v1539_v29  ;;  %v1461_v29 = vld [vmem:[#allocation13 + $0x128] sm:$0xff] }
 0x8f6   :  { %v1840_v44 = vmul.f32 %v1839_v6, %v1759_v45  ;;  %3291 = vmatprep.subr.mxu1 %v3771_v0  ;;  %v1764_v2 = vadd.f32 %v1763_v40, %v1752_v36  ;;  %v1478_v40 = vld [vmem:[#allocation13 + $0x1b0] sm:$0xff] }
 0x8f7   :  { %3292 = vmatpush3.msra.mxu1 %v1440_v32 }
 0x8f8   :  { %3261 = vmatmul.mubr.f32.vlgmr.msra.gmra.mxu0 %v1840_v44  ;;  %3293 = vmatprep.subr.mxu1 %v3771_v0 }
 0x8f9   :  { %3299 = vmatpush3.msra.mxu0 %v4309_v46  ;;  %3330 = vmatprep.mubr.msk.f32.mxu0 %vm3772_vm0, %v3771_v0 }
 0x8fa   :  { %3300 = vmatprep.subr.mxu0 %v3771_v0  ;;  %3294 = vmatpush3.msra.mxu1 %v1439_v33 }
 0x8fb   :  { %3301 = vmatpush3.msra.mxu0 %v4315_v47  ;;  %3333 = vmatprep.subr.mxu1 %v3771_v0 }
 0x8fc   :  { %3302 = vmatprep.subr.mxu0 %v3771_v0 }
 0x8fd   :  { %3303 = vmatpush3.msra.mxu0 %v4319_v48 }
 0x8fe   :  { %3304 = vmatprep.subr.mxu0 %v3771_v0 }
 0x8ff   :  { %3305 = vmatpush3.msra.mxu0 %v4323_v51 }
 0x900   :  { %3306 = vmatprep.subr.mxu0 %v3771_v0 }
 0x901   :  { %3307 = vmatpush3.msra.mxu0 %v4327_v52 }
 0x902   :  { %3308 = vmatprep.subr.mxu0 %v3771_v0 }
 0x903   :  { %3309 = vmatpush3.msra.mxu0 %v4331_v53 }
 0x904   :  { %3310 = vmatprep.subr.mxu0 %v3771_v0 }
 0x905   :  { %3311 = vmatpush3.msra.mxu0 %v4335_v54 }
 0x906   :  { %3312 = vmatprep.subr.mxu0 %v3771_v0 }
 0x907   :  { %3313 = vmatpush3.msra.mxu0 %v4339_v55 }
 0x908   :  { %3314 = vmatprep.subr.mxu0 %v3771_v0 }
 0x909   :  { %3315 = vmatpush3.msra.mxu0 %v4343_v57 }
 0x90a   :  { %3316 = vmatprep.subr.mxu0 %v3771_v0 }
 0x90b   :  { %3317 = vmatpush3.msra.mxu0 %v4347_v58 }
 0x90c   :  { %3318 = vmatprep.subr.mxu0 %v3771_v0 }
 0x90d   :  { %3319 = vmatpush3.msra.mxu0 %v4351_v59 }
 0x90e   :  { %3320 = vmatprep.subr.mxu0 %v3771_v0 }
 0x90f   :  { %3321 = vmatpush3.msra.mxu0 %v4355_v60 }
 0x910   :  { %3322 = vmatprep.subr.mxu0 %v3771_v0 }
 0x911   :  { %3323 = vmatpush3.msra.mxu0 %v4359_v61 }
 0x912   :  { %3324 = vmatprep.subr.mxu0 %v3771_v0 }
 0x913   :  { %3325 = vmatpush3.msra.mxu0 %v4363_v63 }
 0x914   :  { %3326 = vmatprep.subr.mxu0 %v3771_v0 }
 0x915   :  { %3327 = vmatpush3.msra.mxu0 %v4367_v1 }
 0x916   :  { %3328 = vmatprep.subr.mxu0 %v3771_v0 }
 0x917   :  { %3329 = vmatpush3.msra.mxu0 %v4371_v3 }
 0x99a   :  { %v1832_v34 = vpop.f32.mrf.mxu1 }
 0x99c   :  { %v3227_v35 = vpop.f32.mrf.mxu1 }
 0x9b8   :  { %v1907_v38 = vpop.f32.mrf.mxu0 }
 0x9b9   :  { %v1911_v43 = vrot.slane %v1907_v38, 4 }
 0x9ba   :  { %v3262_v10 = vpop.f32.mrf.mxu0 }
 0x9bb   :  { %v1912_v11 = vmax.f32 %v1907_v38, %v1911_v43  ;;  %v1487_v43 = vld [vmem:[#allocation13 + $0x1f8] sm:$0xff]  ;;  %v1486_v10 = vld [vmem:[#allocation13 + $0x1f0] sm:$0xff] }
 0x9bc   :  { %2210 = vmatprep.subr.mxu0 %v1487_v43  ;;  %v1501_v43 = vld [vmem:[#allocation14 + $0x160] sm:$0xff] }
 0x9bd   :  { %v1913_v12 = vrot.slane %v1912_v11, 2 }
 0x9bf   :  { %v1914_v13 = vmax.f32 %v1912_v11, %v1913_v12  ;;  %v1485_v11 = vld [vmem:[#allocation13 + $0x1e8] sm:$0xff]  ;;  %v1484_v12 = vld [vmem:[#allocation13 + $0x1e0] sm:$0xff] }
 0x9c1   :  { %v1915_v15 = vrot.slane %v1914_v13, 1 }
 0x9c3   :  { %v1916_v16 = vmax.f32 %v1914_v13, %v1915_v15  ;;  %v1483_v13 = vld [vmem:[#allocation13 + $0x1d8] sm:$0xff]  ;;  %v1482_v15 = vld [vmem:[#allocation13 + $0x1d0] sm:$0xff] }
 0x9c5   :  { %v1917_v17 = vmax.f32 %v1832_v34, %v1916_v16  ;;  %v1481_v16 = vld [vmem:[#allocation13 + $0x1c8] sm:$0xff] }
 0x9c7   :  { %v1924_v19 = vrot.slane %v1917_v17, %v3939_v39  ;;  %v1918_v22 = vsub.f32 %v1832_v34, %v1917_v17  ;;  %v1480_v17 = vld [vmem:[#allocation13 + $0x1c0] sm:$0xff] }
 0x9c9   :  { %v1925_v20 = vsub.f32 %v1907_v38, %v1924_v19  ;;  %v1919_v9 = vmul.f32 1.442695, %v1918_v22  ;;  %v1479_v19 = vld [vmem:[#allocation13 + $0x1b8] sm:$0xff] }
 0x9cb   :  { %v1926_v21 = vmul.f32 1.442695, %v1925_v20 }
 0x9cd   :  { %3474 = vpow2.f32 %v1926_v21 }
 0x9ce   :  { %3476 = vpow2.f32 %v1919_v9  ;;  %v1477_v9 = vld [vmem:[#allocation13 + $0x1a8] sm:$0xff] }
 0x9da   :  { %v3475_v6 = vpop.eup %3474 }
 0x9db   :  { %v1928_v45 = vrot.slane %v3475_v6, 4  ;;  %v1936_v44 = vmul.f32 %v3475_v6, %v1764_v2  ;;  %v3477_v26 = vpop.eup %3476  ;;  %v1476_v2 = vld [vmem:[#allocation13 + $0x1a0] sm:$0xff] }
 0x9dc   :  { %v1935_v33 = vmul.f32 %v3477_v26, %v1681_v31  ;;  %v1459_v31 = vld [vmem:[#allocation13 + $0x118] sm:$0xff] }
 0x9dd   :  { %v1929_v4 = vadd.f32 %v3475_v6, %v1928_v45  ;;  %v1937_v5 = vrot.slane %v1936_v44, 4  ;;  %v1475_v6 = vld [vmem:[#allocation13 + $0x198] sm:$0xff]  ;;  %v1474_v45 = vld [vmem:[#allocation13 + $0x190] sm:$0xff] }
 0x9df   :  { %v1930_v7 = vrot.slane %v1929_v4, 2  ;;  %v1938_v42 = vadd.f32 %v1937_v5, %v1936_v44  ;;  %v1473_v44 = vld [vmem:[#allocation13 + $0x188] sm:$0xff]  ;;  %v1471_v5 = vld [vmem:[#allocation13 + $0x178] sm:$0xff] }
 0x9e1   :  { %v1931_v8 = vadd.f32 %v1930_v7, %v1929_v4  ;;  %v1939_v25 = vrot.slane %v1938_v42, 2  ;;  %v1472_v4 = vld [vmem:[#allocation13 + $0x180] sm:$0xff]  ;;  %v1470_v7 = vld [vmem:[#allocation13 + $0x170] sm:$0xff] }
 0x9e3   :  { %v1932_v23 = vrot.slane %v1931_v8, 1  ;;  %v1940_v28 = vadd.f32 %v1939_v25, %v1938_v42  ;;  %v1468_v42 = vld [vmem:[#allocation13 + $0x160] sm:$0xff]  ;;  %v1465_v25 = vld [vmem:[#allocation13 + $0x148] sm:$0xff] }
 0x9e5   :  { %v1933_v24 = vadd.f32 %v1932_v23, %v1931_v8  ;;  %v1941_v30 = vrot.slane %v1940_v28, 1  ;;  %v1469_v8 = vld [vmem:[#allocation13 + $0x168] sm:$0xff]  ;;  %v1467_v23 = vld [vmem:[#allocation13 + $0x158] sm:$0xff] }
 0x9e7   :  { %v1934_v27 = vadd.f32 %v3477_v26, %v1933_v24  ;;  %v1942_v32 = vadd.f32 %v1941_v30, %v1940_v28  ;;  %v1466_v24 = vld [vmem:[#allocation13 + $0x150] sm:$0xff]  ;;  %v1464_v26 = vld [vmem:[#allocation13 + $0x140] sm:$0xff] }
 0x9e8   :  { %v1462_v28 = vld [vmem:[#allocation13 + $0x130] sm:$0xff]  ;;  %v1460_v30 = vld [vmem:[#allocation13 + $0x120] sm:$0xff] }
 0x9e9   :  { %3478 = vrcp.f32 %v1934_v27  ;;  %v1943_v34 = vadd.f32 %v1942_v32, %v1935_v33  ;;  %v1463_v27 = vld [vmem:[#allocation13 + $0x138] sm:$0xff]  ;;  %v1458_v32 = vld [vmem:[#allocation13 + $0x110] sm:$0xff]  ;;  %v1457_v33 = vld [vmem:[#allocation13 + $0x108] sm:$0xff] }
 0x9f6   :  { %v3479_v35 = vpop.eup %3478 }
 0x9f7   :  { %v1945_v36 = vmul.f32 %v3479_v35, %v1943_v34  ;;  %v1456_v34 = vld [vmem:[#allocation13 + $0x100] sm:$0xff]  ;;  %v1520_v35 = vld [vmem:[#allocation14 + $0x1f8] sm:$0xff] }
 0x9f9   :  { %3296 = vmatmul.mubr.f32.vlgmr.msra.gmra.mxu1 %v1945_v36  ;;  %v1504_v36 = vld [vmem:[#allocation14 + $0x178] sm:$0xff] }
 0x9fa   :  { %3334 = vmatpush3.msra.mxu1 %v4309_v46  ;;  %3365 = vmatprep.mubr.msk.f32.mxu1 %vm3772_vm0, %v3771_v0 }
 0x9fb   :  { %3335 = vmatprep.subr.mxu1 %v3771_v0 }
 0x9fc   :  { %3336 = vmatpush3.msra.mxu1 %v4315_v47 }
 0x9fd   :  { %3337 = vmatprep.subr.mxu1 %v3771_v0 }
 0x9fe   :  { %3338 = vmatpush3.msra.mxu1 %v4319_v48 }
 0x9ff   :  { %3339 = vmatprep.subr.mxu1 %v3771_v0 }
 0xa00   :  { %3340 = vmatpush3.msra.mxu1 %v4323_v51 }
 0xa01   :  { %3341 = vmatprep.subr.mxu1 %v3771_v0 }
 0xa02   :  { %3342 = vmatpush3.msra.mxu1 %v4327_v52 }
 0xa03   :  { %3343 = vmatprep.subr.mxu1 %v3771_v0 }
 0xa04   :  { %3344 = vmatpush3.msra.mxu1 %v4331_v53 }
 0xa05   :  { %3345 = vmatprep.subr.mxu1 %v3771_v0 }
 0xa06   :  { %3346 = vmatpush3.msra.mxu1 %v4335_v54 }
 0xa07   :  { %3347 = vmatprep.subr.mxu1 %v3771_v0 }
 0xa08   :  { %3348 = vmatpush3.msra.mxu1 %v4339_v55 }
 0xa09   :  { %3349 = vmatprep.subr.mxu1 %v3771_v0 }
 0xa0a   :  { %3350 = vmatpush3.msra.mxu1 %v4343_v57 }
 0xa0b   :  { %3351 = vmatprep.subr.mxu1 %v3771_v0 }
 0xa0c   :  { %3352 = vmatpush3.msra.mxu1 %v4347_v58 }
 0xa0d   :  { %3353 = vmatprep.subr.mxu1 %v3771_v0 }
 0xa0e   :  { %3354 = vmatpush3.msra.mxu1 %v4351_v59 }
 0xa0f   :  { %3355 = vmatprep.subr.mxu1 %v3771_v0 }
 0xa10   :  { %3356 = vmatpush3.msra.mxu1 %v4355_v60 }
 0xa11   :  { %3357 = vmatprep.subr.mxu1 %v3771_v0 }
 0xa12   :  { %3358 = vmatpush3.msra.mxu1 %v4359_v61 }
 0xa13   :  { %3359 = vmatprep.subr.mxu1 %v3771_v0 }
 0xa14   :  { %3360 = vmatpush3.msra.mxu1 %v4363_v63 }
 0xa15   :  { %3361 = vmatprep.subr.mxu1 %v3771_v0 }
 0xa16   :  { %3362 = vmatpush3.msra.mxu1 %v4367_v1 }
 0xa17   :  { %3363 = vmatprep.subr.mxu1 %v3771_v0 }
 0xa18   :  { %3364 = vmatpush3.msra.mxu1 %v4371_v3 }
 0xa19   :  { %2809 = vmatprep.subr.mxu1 %v1520_v35  ;;  %v1490_v35 = vld [vmem:[#allocation14 + $0x108] sm:$0xff] }
 0xab9   :  { %v2015_v62 = vpop.f32.mrf.mxu1 }
 0xaba   :  { %v2016_v14 = vadd.f32 %v2015_v62, %v1947_v37  ;;  %v1519_v37 = vld [vmem:[#allocation14 + $0x1f0] sm:$0xff] }
 0xabb   :  { %v3297_v18 = vpop.f32.mrf.mxu1  ;;  %v1503_v62 = vld [vmem:[#allocation14 + $0x170] sm:$0xff] }
 0xabc   :  { %v2019_v38 = vadd.f32 %v2016_v14, %v4213_v50  ;;  %v1518_v14 = vld [vmem:[#allocation14 + $0x1e8] sm:$0xff] }
 0xabd   :  { %v1502_v18 = vld [vmem:[#allocation14 + $0x168] sm:$0xff] }
 0xabe   :  { %3331 = vmatmul.mubr.f32.vlgmr.msra.gmra.mxu0 %v2019_v38 }
 0xabf   :  { %2274 = vmatprep.mubr.f32.mxu0 %v3771_v0  ;;  %2211 = vmatpush1.msra.mxu0 %v1486_v10  ;;  %v1516_v10 = vld [vmem:[#allocation14 + $0x1d8] sm:$0xff] }
 0xac0   :  { %2212 = vmatprep.subr.mxu0 %v1485_v11  ;;  %v1500_v11 = vld [vmem:[#allocation14 + $0x158] sm:$0xff] }
 0xac1   :  { %2213 = vmatpush1.msra.mxu0 %v1484_v12  ;;  %v1515_v12 = vld [vmem:[#allocation14 + $0x1d0] sm:$0xff] }
 0xac2   :  { %2214 = vmatprep.subr.mxu0 %v1483_v13  ;;  %v1499_v13 = vld [vmem:[#allocation14 + $0x150] sm:$0xff] }
 0xac3   :  { %2215 = vmatpush1.msra.mxu0 %v1482_v15  ;;  %v1514_v15 = vld [vmem:[#allocation14 + $0x1c8] sm:$0xff] }
 0xac4   :  { %2216 = vmatprep.subr.mxu0 %v1481_v16  ;;  %v1498_v16 = vld [vmem:[#allocation14 + $0x148] sm:$0xff] }
 0xac5   :  { %2217 = vmatpush1.msra.mxu0 %v1480_v17  ;;  %v1513_v17 = vld [vmem:[#allocation14 + $0x1c0] sm:$0xff] }
 0xac6   :  { %2218 = vmatprep.subr.mxu0 %v1479_v19  ;;  %v1497_v19 = vld [vmem:[#allocation14 + $0x140] sm:$0xff] }
 0xac7   :  { %2219 = vmatpush1.msra.mxu0 %v1478_v40  ;;  %v1495_v40 = vld [vmem:[#allocation14 + $0x130] sm:$0xff] }
 0xac8   :  { %2220 = vmatprep.subr.mxu0 %v1477_v9  ;;  %v1510_v9 = vld [vmem:[#allocation14 + $0x1a8] sm:$0xff] }
 0xac9   :  { %2221 = vmatpush1.msra.mxu0 %v1476_v2  ;;  %v1494_v2 = vld [vmem:[#allocation14 + $0x128] sm:$0xff] }
 0xaca   :  { %2222 = vmatprep.subr.mxu0 %v1475_v6  ;;  %v1509_v6 = vld [vmem:[#allocation14 + $0x1a0] sm:$0xff] }
 0xacb   :  { %2223 = vmatpush1.msra.mxu0 %v1474_v45  ;;  %v1493_v45 = vld [vmem:[#allocation14 + $0x120] sm:$0xff] }
 0xacc   :  { %2224 = vmatprep.subr.mxu0 %v1473_v44 }
 0xacd   :  { %2225 = vmatpush1.msra.mxu0 %v1472_v4 }
 0xace   :  { %2226 = vmatprep.subr.mxu0 %v1471_v5 }
 0xacf   :  { %2227 = vmatpush1.msra.mxu0 %v1470_v7  ;;  %v2170_v7 = vrot.slane %v4304_v49, %v4093_v56 }
 0xad0   :  { %2228 = vmatprep.subr.mxu0 %v1469_v8 }
 0xad1   :  { %2229 = vmatpush1.msra.mxu0 %v1468_v42  ;;  %v2171_v8 = vcombine.high %v2170_v7, %v2170_v7  ;;  %v2182_v42 = vcombine.high %v4304_v49, %v4304_v49 }
 0xad2   :  { %2230 = vmatprep.subr.mxu0 %v1467_v23 }
 0xad3   :  { %2231 = vmatpush1.msra.mxu0 %v1466_v24  ;;  %v2178_v23 = vrot.slane %v2171_v8, %v4093_v56  ;;  %v4444_v24 = vrot.slane %v2182_v42, %v4093_v56 }
 0xad4   :  { %2232 = vmatprep.subr.mxu0 %v1465_v25 }
 0xad5   :  { %2233 = vmatpush1.msra.mxu0 %v1464_v26  ;;  %v2179_v25 = vcombine.high %v2178_v23, %v2178_v23 }
 0xad6   :  { %2234 = vmatprep.subr.mxu0 %v1463_v27 }
 0xad7   :  { %2235 = vmatpush1.msra.mxu0 %v1462_v28  ;;  %v4449_v28 = vrot.slane %v4444_v24, %v4093_v56 }
 0xad8   :  { %2236 = vmatprep.subr.mxu0 %v1461_v29 }
 0xad9   :  { %2237 = vmatpush1.msra.mxu0 %v1460_v30 }
 0xada   :  { %2238 = vmatprep.subr.mxu0 %v1459_v31  ;;  %v1492_v31 = vld [vmem:[#allocation14 + $0x118] sm:$0xff] }
 0xadb   :  { %2239 = vmatpush1.msra.mxu0 %v1458_v32  ;;  %v1507_v32 = vld [vmem:[#allocation14 + $0x190] sm:$0xff] }
 0xadc   :  { %2240 = vmatprep.subr.mxu0 %v1457_v33  ;;  %v1491_v33 = vld [vmem:[#allocation14 + $0x110] sm:$0xff] }
 0xadd   :  { %2241 = vmatpush1.msra.mxu0 %v1456_v34  ;;  %v1506_v34 = vld [vmem:[#allocation14 + $0x188] sm:$0xff] }
 0xade   :  { %3368 = vmatprep.subr.mxu0 %v3771_v0 }
 0xb7e   :  { %v2086_v50 = vpop.f32.mrf.mxu0 }
 0xb7f   :  { %v4433_v20 = vsub.f32 %v2019_v38, %v2086_v50  ;;  %v1517_v38 = vld [vmem:[#allocation14 + $0x1e0] sm:$0xff]  ;;  %v1512_v50 = vld [vmem:[#allocation14 + $0x1b8] sm:$0xff] }
 0xb80   :  { %v3332_v21 = vpop.f32.mrf.mxu0 }
 0xb81   :  { %v2091_v22 = vmul.f32 %v4433_v20, %v4433_v20  ;;  %v1496_v21 = vld [vmem:[#allocation14 + $0x138] sm:$0xff] }
 0xb83   :  { %3366 = vmatmul.mubr.f32.vlgmr.msra.gmra.mxu1 %v2091_v22  ;;  %v1511_v22 = vld [vmem:[#allocation14 + $0x1b0] sm:$0xff] }
 0xb84   :  { %2810 = vmatpush3.msra.mxu1 %v1504_v36  ;;  %v1505_v36 = vld [vmem:[#allocation14 + $0x180] sm:$0xff] }
 0xb85   :  { %2811 = vmatprep.subr.mxu1 %v1519_v37  ;;  %v1489_v37 = vld [vmem:[#allocation14 + $0x100] sm:$0xff] }
 0xb86   :  { %2812 = vmatpush3.msra.mxu1 %v1503_v62  ;;  %v1524_v62 = vld [vmem:[#allocation17 + $0x2] sm:$0x3] }
 0xb87   :  { %2813 = vmatprep.subr.mxu1 %v1518_v14  ;;  %v2203_v14 = vrot.slane %v1524_v62, %v3939_v39 }
 0xb88   :  { %2814 = vmatpush3.msra.mxu1 %v1502_v18  ;;  %v2207_v18 = vrot.slane %v1524_v62, %v3944_v41  ;;  %v2283_v41 = vrot.slane %v4304_v49, 5 }
 0xb89   :  { %2815 = vmatprep.subr.mxu1 %v1517_v38 }
 0xb8a   :  { %2816 = vmatpush3.msra.mxu1 %v1501_v43 }
 0xb8b   :  { %2817 = vmatprep.subr.mxu1 %v1516_v10 }
 0xb8c   :  { %2818 = vmatpush3.msra.mxu1 %v1500_v11 }
 0xb8d   :  { %2819 = vmatprep.subr.mxu1 %v1515_v12 }
 0xb8e   :  { %2820 = vmatpush3.msra.mxu1 %v1499_v13 }
 0xb8f   :  { %2821 = vmatprep.subr.mxu1 %v1514_v15 }
 0xb90   :  { %2822 = vmatpush3.msra.mxu1 %v1498_v16 }
 0xb91   :  { %2823 = vmatprep.subr.mxu1 %v1513_v17 }
 0xb92   :  { %2824 = vmatpush3.msra.mxu1 %v1497_v19 }
 0xb93   :  { %2825 = vmatprep.subr.mxu1 %v1512_v50 }
 0xb94   :  { %2826 = vmatpush3.msra.mxu1 %v1496_v21 }
 0xb95   :  { %2827 = vmatprep.subr.mxu1 %v1511_v22 }
 0xb96   :  { %2828 = vmatpush3.msra.mxu1 %v1495_v40 }
 0xb97   :  { %2829 = vmatprep.subr.mxu1 %v1510_v9 }
 0xb98   :  { %2830 = vmatpush3.msra.mxu1 %v1494_v2 }
 0xb99   :  { %2831 = vmatprep.subr.mxu1 %v1509_v6 }
 0xb9a   :  { %2832 = vmatpush3.msra.mxu1 %v1493_v45 }
 0xc43   :  { %v2158_v44 = vpop.f32.mrf.mxu1 }
 0xc44   :  { %v2159_v4 = vadd.f32 1e-05, %v2158_v44 }
 0xc45   :  { %v3367_v5 = vpop.f32.mrf.mxu1 }
 0xc46   :  { %3480 = vrsqrt.f32 %v2159_v4 }
 0xc53   :  { %v3481_v26 = vpop.eup %3480 }
 0xc54   :  { %v2163_v27 = vmul.f32 %v3481_v26, %v4433_v20  ;;  %v1508_v20 = vld [vmem:[#allocation14 + $0x198] sm:$0xff] }
 0xc55   :  { %2833 = vmatprep.subr.mxu1 %v1508_v20 }
 0xc56   :  { %v2181_v29 = vmul.f32 %v2179_v25, %v2163_v27  ;;  %2834 = vmatpush3.msra.mxu1 %v1492_v31 }
 0xc57   :  { %2835 = vmatprep.subr.mxu1 %v1507_v32 }
 0xc58   :  { %v4452_v30 = vadd.f32 %v4449_v28, %v2181_v29  ;;  %2836 = vmatpush3.msra.mxu1 %v1491_v33 }
 0xc59   :  { %2837 = vmatprep.subr.mxu1 %v1506_v34 }
 0xc5a   :  { %2275 = vmatmul.mubr.f32.vlgmr.msra.gmra.mxu0 %v4452_v30  ;;  %2838 = vmatpush3.msra.mxu1 %v1490_v35 }
 0xc5b   :  { %3369 = vmatpush3.msra.mxu0 %v4309_v46  ;;  %3400 = vmatprep.mubr.msk.f32.mxu0 %vm3772_vm0, %v3771_v0 }
 0xc5c   :  { %3370 = vmatprep.subr.mxu0 %v3771_v0  ;;  %2839 = vmatprep.subr.mxu1 %v1505_v36 }
 0xc5d   :  { %3371 = vmatpush3.msra.mxu0 %v4315_v47  ;;  %2840 = vmatpush3.msra.mxu1 %v1489_v37 }
 0xc5e   :  { %3372 = vmatprep.subr.mxu0 %v3771_v0  ;;  %3403 = vmatprep.subr.mxu1 %v3771_v0 }
 0xc5f   :  { %3373 = vmatpush3.msra.mxu0 %v4319_v48 }
 0xc60   :  { %3374 = vmatprep.subr.mxu0 %v3771_v0 }
 0xc61   :  { %3375 = vmatpush3.msra.mxu0 %v4323_v51 }
 0xc62   :  { %3376 = vmatprep.subr.mxu0 %v3771_v0 }
 0xc63   :  { %3377 = vmatpush3.msra.mxu0 %v4327_v52 }
 0xc64   :  { %3378 = vmatprep.subr.mxu0 %v3771_v0 }
 0xc65   :  { %3379 = vmatpush3.msra.mxu0 %v4331_v53 }
 0xc66   :  { %3380 = vmatprep.subr.mxu0 %v3771_v0 }
 0xc67   :  { %3381 = vmatpush3.msra.mxu0 %v4335_v54 }
 0xc68   :  { %3382 = vmatprep.subr.mxu0 %v3771_v0 }
 0xc69   :  { %3383 = vmatpush3.msra.mxu0 %v4339_v55 }
 0xc6a   :  { %3384 = vmatprep.subr.mxu0 %v3771_v0 }
 0xc6b   :  { %3385 = vmatpush3.msra.mxu0 %v4343_v57 }
 0xc6c   :  { %3386 = vmatprep.subr.mxu0 %v3771_v0 }
 0xc6d   :  { %3387 = vmatpush3.msra.mxu0 %v4347_v58 }
 0xc6e   :  { %3388 = vmatprep.subr.mxu0 %v3771_v0 }
 0xc6f   :  { %3389 = vmatpush3.msra.mxu0 %v4351_v59 }
 0xc70   :  { %3390 = vmatprep.subr.mxu0 %v3771_v0 }
 0xc71   :  { %3391 = vmatpush3.msra.mxu0 %v4355_v60 }
 0xc72   :  { %3392 = vmatprep.subr.mxu0 %v3771_v0 }
 0xc73   :  { %3393 = vmatpush3.msra.mxu0 %v4359_v61 }
 0xc74   :  { %3394 = vmatprep.subr.mxu0 %v3771_v0 }
 0xc75   :  { %3395 = vmatpush3.msra.mxu0 %v4363_v63 }
 0xc76   :  { %3396 = vmatprep.subr.mxu0 %v3771_v0 }
 0xc77   :  { %3397 = vmatpush3.msra.mxu0 %v4367_v1 }
 0xc78   :  { %3398 = vmatprep.subr.mxu0 %v3771_v0 }
 0xc79   :  { %3399 = vmatpush3.msra.mxu0 %v4371_v3 }
 0xd1a   :  { %v2276_v38 = vpop.f32.mrf.mxu0 }
 0xd1b   :  { %v2277_v43 = vadd.f32 %v2276_v38, %v2203_v14 }
 0xd1c   :  { %v2278_v10 = vpop.f32.mrf.mxu0 }
 0xd1d   :  { %v2279_v11 = vadd.f32 %v2278_v10, %v2207_v18  ;;  %v2281_v13 = vmax.f32 %v2277_v43, 0.0 }
 0xd1f   :  { %v2282_v12 = vmax.f32 %v2279_v11, 0.0 }
 0xd21   :  { %2349 = vmatprep.mubr.f32.mxu1 %v2282_v12 }
 0xd22   :  { %2350 = vmatmul.mubr.f32.vlgmr.msra.gmra.mxu1 %v2281_v13 }
 0xd23   :  { %3404 = vmatpush3.msra.mxu1 %v4309_v46  ;;  %3435 = vmatprep.mubr.msk.f32.mxu1 %vm3772_vm0, %v3771_v0 }
 0xd24   :  { %3405 = vmatprep.subr.mxu1 %v3771_v0 }
 0xd25   :  { %3406 = vmatpush3.msra.mxu1 %v4315_v47 }
 0xd26   :  { %3407 = vmatprep.subr.mxu1 %v3771_v0 }
 0xd27   :  { %3408 = vmatpush3.msra.mxu1 %v4319_v48 }
 0xd28   :  { %3409 = vmatprep.subr.mxu1 %v3771_v0 }
 0xd29   :  { %3410 = vmatpush3.msra.mxu1 %v4323_v51 }
 0xd2a   :  { %3411 = vmatprep.subr.mxu1 %v3771_v0 }
 0xd2b   :  { %3412 = vmatpush3.msra.mxu1 %v4327_v52 }
 0xd2c   :  { %3413 = vmatprep.subr.mxu1 %v3771_v0 }
 0xd2d   :  { %3414 = vmatpush3.msra.mxu1 %v4331_v53 }
 0xd2e   :  { %3415 = vmatprep.subr.mxu1 %v3771_v0 }
 0xd2f   :  { %3416 = vmatpush3.msra.mxu1 %v4335_v54 }
 0xd30   :  { %3417 = vmatprep.subr.mxu1 %v3771_v0 }
 0xd31   :  { %3418 = vmatpush3.msra.mxu1 %v4339_v55 }
 0xd32   :  { %3419 = vmatprep.subr.mxu1 %v3771_v0 }
 0xd33   :  { %3420 = vmatpush3.msra.mxu1 %v4343_v57 }
 0xd34   :  { %3421 = vmatprep.subr.mxu1 %v3771_v0 }
 0xd35   :  { %3422 = vmatpush3.msra.mxu1 %v4347_v58 }
 0xd36   :  { %3423 = vmatprep.subr.mxu1 %v3771_v0 }
 0xd37   :  { %3424 = vmatpush3.msra.mxu1 %v4351_v59 }
 0xd38   :  { %3425 = vmatprep.subr.mxu1 %v3771_v0 }
 0xd39   :  { %3426 = vmatpush3.msra.mxu1 %v4355_v60  ;;  %v2500_v60 = vcombine.high %v4449_v28, %v4449_v28 }
 0xd3a   :  { %3427 = vmatprep.subr.mxu1 %v3771_v0 }
 0xd3b   :  { %3428 = vmatpush3.msra.mxu1 %v4359_v61 }
 0xd3c   :  { %3429 = vmatprep.subr.mxu1 %v3771_v0 }
 0xd3d   :  { %3430 = vmatpush3.msra.mxu1 %v4363_v63 }
 0xd3e   :  { %3431 = vmatprep.subr.mxu1 %v3771_v0 }
 0xd3f   :  { %3432 = vmatpush3.msra.mxu1 %v4367_v1 }
 0xd40   :  { %3433 = vmatprep.subr.mxu1 %v3771_v0  ;;  %v2503_v0 = vcombine.high %v4444_v24, %v4444_v24 }
 0xd41   :  { %3434 = vmatpush3.msra.mxu1 %v4371_v3 }
 0xd42   :  { %v2510_v49 = vrot.slane %v2503_v0, %v4093_v56 }
 0xd44   :  { %v2511_v1 = vcombine.high %v2510_v49, %v2510_v49 }
 0xde2   :  { %v2841_v39 = vpop.f32.mrf.mxu1 }
 0xde4   :  { %v2842_v46 = vpop.f32.mrf.mxu1 }
 0xde5   :  { %v2843_v47 = vadd.f32 %v2842_v46, %v2841_v39 }
 0xde7   :  { %v2352_v48 = vadd.f32 %v2843_v47, %v2283_v41 }
 0xde9   :  { %v2355_v51 = vadd.f32 %v2352_v48, %v4452_v30 }
 0xdeb   :  { %3401 = vmatmul.mubr.f32.vlgmr.msra.gmra.mxu0 %v2355_v51 }
 0xeab   :  { %v2422_v52 = vpop.f32.mrf.mxu0 }
 0xeac   :  { %v2426_v53 = vsub.f32 %v2355_v51, %v2422_v52 }
 0xead   :  { %v3402_v54 = vpop.f32.mrf.mxu0 }
 0xeae   :  { %v2427_v55 = vmul.f32 %v2426_v53, %v2426_v53 }
 0xeb0   :  { %3436 = vmatmul.mubr.f32.vlgmr.msra.gmra.mxu1 %v2427_v55 }
 0xf70   :  { %v2494_v57 = vpop.f32.mrf.mxu1 }
 0xf71   :  { %v2495_v58 = vadd.f32 1e-05, %v2494_v57 }
 0xf72   :  { %v3437_v59 = vpop.f32.mrf.mxu1 }
 0xf73   :  { %3482 = vrsqrt.f32 %v2495_v58 }
 0xf80   :  { %v3483_v61 = vpop.eup %3482 }
 0xf81   :  { %v2499_v63 = vmul.f32 %v3483_v61, %v2426_v53 }
 0xf83   :  { %v2502_v3 = vmul.f32 %v2500_v60, %v2499_v63 }
 0xf85   :  { %v2513_v15 = vadd.f32 %v2511_v1, %v2502_v3 }
 0xf87   :  { %2514 = vst [vmem:[#allocation19] sm:$0x1] %v2513_v15 }
 0xf88   :  { %3728 = shalt.err (!%p3725_p12)
}
 0xf89   :  { %2524 = dma.vmem_to_hbm [thread:$0]  %s2522_s30, 16, %s4545_s11, [#allocation4]  }
 0xf8a   :  { %3749 = dma.done.wait [#allocation4], 16  }
 0xf8b   :  { %3750 = vsyncadd [#allocation4], 4294967280 }
 0xf8c   :  { %2528 = vsyncpa [#allocation3], 1 }
 0xf8d   :  { %2529 = vsyncpa [#allocation6], 1 }
 0xf8e   :  { %2530 = vsyncpa [#allocation9], 1 }
 0xf8f   :  { %2531 = vsyncpa [#allocation12], 1 }
 0xf90   :  { %2532 = vsyncpa [#allocation15], 1 }
 0xf91   :  { %2533 = vsyncpa [#allocation18], 1 }
 0xf92   :  { %2534 = vsyncpa [#allocation4], 1 }

</bundles_post_ra>
